<compile_context>
chip_gen: v6e
topology: v6e:2x2x1
jax: 0.10.0
libtpu: 0.0.40
codegen_flags: <defaults>
</compile_context>

<pallas_src>
import jax
import jax.numpy as jnp
from jax.experimental import pallas as pl
from jax.experimental.pallas import tpu as pltpu

LANES = 128


def _round_up(n, m):
    return ((n + m - 1) // m) * m


# -----------------------------------------------------------------------------
# Kernel
# -----------------------------------------------------------------------------
def _simple_cnn_kernel(x_ref, t1_ref, b1_ref, t2_ref, b2_ref,
                       fw1_ref, fb1_ref, fw2_ref, fb2_ref, o_ref):
    f32, bf16 = jnp.float32, jnp.bfloat16
    bt = x_ref.shape[1]                      # images in this grid step

    x = x_ref[...]                           # (28, bt, 128) f32; rows = (h, b)

    # ---- conv1: 5x5, Cin=1 -> Cout=10, as 5 Toeplitz MXU matmuls ------------
    # Output lane L = parity*128 + (w//2)*10 + c   (w = out column, c = chan).
    acc1 = jnp.zeros((24 * bt, 256), f32)
    for i in range(5):                       # kernel row i
        lhs = x[i:i + 24].reshape(24 * bt, LANES).astype(bf16)
        acc1 = acc1 + jnp.dot(lhs, t1_ref[i], preferred_element_type=f32)
    h1 = jnp.maximum(acc1 + b1_ref[...], 0.0)          # bias + ReLU

    # ---- pool1 (2x2): h-pairs = row-block max, w-pairs = lane-half max ------
    h1 = h1.reshape(12, 2 * bt, 256)
    h1 = jnp.maximum(h1[:, :bt, :], h1[:, bt:, :])      # (12, bt, 256)
    p1 = jnp.maximum(h1[..., :LANES], h1[..., LANES:])  # (12, bt, 128) f32

    # ---- conv2: 5x5, Cin=10 -> Cout=20, packed-lane Toeplitz matmuls --------
    # Output lane M = parity*128 + (w2//2)*20 + c2.
    acc2 = jnp.zeros((8 * bt, 256), f32)
    for i in range(5):
        lhs = p1[i:i + 8].reshape(8 * bt, LANES).astype(bf16)
        acc2 = acc2 + jnp.dot(lhs, t2_ref[i], preferred_element_type=f32)
    h2 = jnp.maximum(acc2 + b2_ref[...], 0.0)

    # ---- pool2 (2x2) ---------------------------------------------------------
    h2 = h2.reshape(4, 2 * bt, 256)
    h2 = jnp.maximum(h2[:, :bt, :], h2[:, bt:, :])      # (4, bt, 256)
    p2 = jnp.maximum(h2[..., :LANES], h2[..., LANES:])  # (4, bt, 128) f32

    # ---- flatten + fc1 + ReLU (flatten order folded into fw1 packing) -------
    acc3 = jnp.zeros((bt, LANES), f32)
    for hq in range(4):
        acc3 = acc3 + jnp.dot(p2[hq].astype(bf16), fw1_ref[hq],
                              preferred_element_type=f32)
    h3 = jnp.maximum(acc3 + fb1_ref[...], 0.0)          # (bt, 128)

    # ---- fc2 -----------------------------------------------------------------
    logits = jnp.dot(h3.astype(bf16), fw2_ref[...],
                     preferred_element_type=f32) + fb2_ref[...]
    o_ref[...] = logits.astype(o_ref.dtype)             # (bt, 128), lane-dense


# -----------------------------------------------------------------------------
# Weight packing: PyTorch-layout params -> packed-lane Toeplitz operands
# -----------------------------------------------------------------------------
def _pack_params(params):
    f32, bf16 = jnp.float32, jnp.bfloat16
    w1 = params["conv1_w"].astype(f32)       # (10, 1, 5, 5)
    b1 = params["conv1_b"].astype(f32)       # (10,)
    w2 = params["conv2_w"].astype(f32)       # (20, 10, 5, 5)
    b2 = params["conv2_b"].astype(f32)       # (20,)
    fc1w = params["fc1_w"].astype(f32)       # (50, 320); 320 = (20,4,4) C-order
    fc1b = params["fc1_b"].astype(f32)       # (50,)
    fc2w = params["fc2_w"].astype(f32)       # (nc, 50)
    fc2b = params["fc2_b"].astype(f32)       # (nc,)
    nc = fc2w.shape[0]
    assert nc <= LANES

    # conv1 Toeplitz: T1[i, k, L], L = parity*128 + wp*10 + c, w = 2*wp+parity,
    # T1[i, k, L] = w1[c, 0, i, k - w] when 0 <= k - w < 5 (zero elsewhere).
    k = jnp.arange(128)[:, None]                       # (128, 1) input column
    L = jnp.arange(256)[None, :]                       # (1, 256) packed out lane
    parity, rem = L // 128, L % 128
    wp, c = rem // 10, rem % 10
    w = 2 * wp + parity
    j = k - w
    valid = (rem < 120) & (j >= 0) & (j < 5)
    taps = w1[c, 0, :, jnp.clip(j, 0, 4)]              # (128, 256, 5)
    t1 = jnp.where(valid[:, :, None], taps, 0.0).transpose(2, 0, 1).astype(bf16)

    lane = jnp.arange(256)
    remv = lane % 128
    b1v = jnp.where(remv < 120, b1[remv % 10], 0.0).reshape(1, 256).astype(f32)

    # conv2 Toeplitz: input lane K = ww*10 + c1 (pooled layout), output lane
    # M = parity*128 + wq*20 + c2 with w2out = 2*wq + parity.
    K = jnp.arange(128)[:, None]
    M = jnp.arange(256)[None, :]
    ww, c1 = K // 10, K % 10
    par2, rem2 = M // 128, M % 128
    wq, c2 = rem2 // 20, rem2 % 20
    w2o = 2 * wq + par2
    j2 = ww - w2o
    valid2 = (K < 120) & (rem2 < 80) & (j2 >= 0) & (j2 < 5)
    taps2 = w2[c2, c1, :, jnp.clip(j2, 0, 4)]          # (128, 256, 5)
    t2 = jnp.where(valid2[:, :, None], taps2, 0.0).transpose(2, 0, 1).astype(bf16)

    b2v = jnp.where(remv < 80, b2[remv % 20], 0.0).reshape(1, 256).astype(f32)

    # fc1: pooled lane K2 = wq*20 + c2 at row hq maps to flatten index
    # n = c2*16 + hq*4 + wq (PyTorch (C,H,W) C-order flatten).
    K2 = jnp.arange(128)
    wqf, c2f = K2 // 20, K2 % 20
    validf = K2 < 80
    hq = jnp.arange(4)[:, None]
    n = jnp.where(validf[None, :], c2f[None, :] * 16 + hq * 4 + wqf[None, :], 0)
    vals = jnp.where(validf[None, None, :], fc1w[:, n], 0.0)     # (50, 4, 128)
    fw1 = (jnp.zeros((4, LANES, LANES), f32)
           .at[:, :, :50].set(vals.transpose(1, 2, 0)).astype(bf16))
    fb1 = jnp.zeros((1, LANES), f32).at[0, :50].set(fc1b)

    fw2 = jnp.zeros((LANES, LANES), f32).at[:50, :nc].set(fc2w.T).astype(bf16)
    fb2 = jnp.zeros((1, LANES), f32).at[0, :nc].set(fc2b)

    return (t1, b1v, t2, b2v, fw1, fb1, fw2, fb2), nc


# -----------------------------------------------------------------------------
# Wrapper
# -----------------------------------------------------------------------------
@jax.jit
def simple_cnn_forward(params, x):
    """x: (B, 1, 28, 28) float32 NCHW -> (B, num_classes) float32 logits."""
    B = x.shape[0]
    assert x.shape[1:] == (1, 28, 28), "SimpleCNN expects 1x28x28 inputs"
    (t1, b1v, t2, b2v, fw1, fb1, fw2, fb2), nc = _pack_params(params)

    # Batch tile: multiple of 8 sublanes; cap at 32 images / grid step.
    BT = 32 if B > 16 else _round_up(B, 8)
    Bp = _round_up(B, BT)

    # Layout plumbing in the wrapper (cheap XLA ops, outside the kernel):
    # pad W 28->128 lanes, put batch innermost in the row dim -> (28, Bp, 128).
    xin = x.astype(jnp.float32).reshape(B, 28, 28)
    xin = jnp.pad(xin, ((0, Bp - B), (0, 0), (0, LANES - 28)))
    xin = xin.transpose(1, 0, 2)                       # (28, Bp, 128)

    const2 = lambda b: (0, 0)
    const3 = lambda b: (0, 0, 0)
    out = pl.pallas_call(
        _simple_cnn_kernel,
        out_shape=jax.ShapeDtypeStruct((Bp, LANES), jnp.float32),
        grid=(Bp // BT,),
        in_specs=[
            pl.BlockSpec((28, BT, LANES), lambda b: (0, b, 0)),   # image tile
            pl.BlockSpec((5, LANES, 256), const3),                # conv1 Toeplitz
            pl.BlockSpec((1, 256), const2),                       # conv1 bias
            pl.BlockSpec((5, LANES, 256), const3),                # conv2 Toeplitz
            pl.BlockSpec((1, 256), const2),                       # conv2 bias
            pl.BlockSpec((4, LANES, LANES), const3),              # fc1 w (packed)
            pl.BlockSpec((1, LANES), const2),                     # fc1 b
            pl.BlockSpec((LANES, LANES), const2),                 # fc2 w
            pl.BlockSpec((1, LANES), const2),                     # fc2 b
        ],
        out_specs=pl.BlockSpec((BT, LANES), lambda b: (b, 0)),
        compiler_params=pltpu.CompilerParams(
            dimension_semantics=("parallel",),     # megacore-shard the batch
            vmem_limit_bytes=32 * 1024 * 1024,
        ),
    )(xin, t1, b1v, t2, b2v, fw1, fb1, fw2, fb2)
    return out[:B, :nc]


# -----------------------------------------------------------------------------
# Deterministic parameter init (PyTorch-style uniform fan-in init)
# -----------------------------------------------------------------------------
def init_params(key, num_classes=10):
    def uniform(key, shape, fan_in):
        bound = 1.0 / jnp.sqrt(jnp.asarray(fan_in, jnp.float32))
        return jax.random.uniform(key, shape, jnp.float32, -bound, bound)

    ks = jax.random.split(key, 8)
    return {
        "conv1_w": uniform(ks[0], (10, 1, 5, 5), 1 * 5 * 5),
        "conv1_b": uniform(ks[1], (10,), 1 * 5 * 5),
        "conv2_w": uniform(ks[2], (20, 10, 5, 5), 10 * 5 * 5),
        "conv2_b": uniform(ks[3], (20,), 10 * 5 * 5),
        "fc1_w": uniform(ks[4], (50, 320), 320),
        "fc1_b": uniform(ks[5], (50,), 320),
        "fc2_w": uniform(ks[6], (num_classes, 50), 50),
        "fc2_b": uniform(ks[7], (num_classes,), 50),
    }


if __name__ == "__main__":
    key = jax.random.PRNGKey(0)
    pkey, xkey = jax.random.split(key)
    params = init_params(pkey, num_classes=10)
    # MNIST-shaped input (28x28 required so flatten -> 320), small batch.
    x = jax.random.normal(xkey, (2, 1, 28, 28), jnp.float32)
    out = simple_cnn_forward(params, x)
    out = jax.block_until_ready(out)
    assert out.shape == (2, 10) and out.dtype == jnp.float32
    print("KERNEL_OK")
</pallas_src>

<mosaic_0001>
module attributes {stable_mosaic.version = 11 : i64} {
  func.func @_simple_cnn_kernel(%arg0: i32, %arg1: memref<28x8x128xf32, #tpu.memory_space<vmem>>, %arg2: memref<5x128x256xbf16, #tpu.memory_space<vmem>>, %arg3: memref<1x256xf32, #tpu.memory_space<vmem>>, %arg4: memref<5x128x256xbf16, #tpu.memory_space<vmem>>, %arg5: memref<1x256xf32, #tpu.memory_space<vmem>>, %arg6: memref<4x128x128xbf16, #tpu.memory_space<vmem>>, %arg7: memref<1x128xf32, #tpu.memory_space<vmem>>, %arg8: memref<128x128xbf16, #tpu.memory_space<vmem>>, %arg9: memref<1x128xf32, #tpu.memory_space<vmem>>, %arg10: memref<8x128xf32, #tpu.memory_space<vmem>>) attributes {dimension_semantics = [#tpu.dimension_semantics<parallel>], iteration_bounds = array<i64: 1>, scalar_prefetch = 0 : i64, scratch_operands = 0 : i64, tpu.core_type = #tpu.core_type<tc>, window_params = [{transform_indices = @transform_0, window_bounds = array<i64: 28, 8, 128>}, {pipeline_mode = #tpu.pipeline_mode<synchronous>, transform_indices = @transform_1, window_bounds = array<i64: 5, 128, 256>}, {pipeline_mode = #tpu.pipeline_mode<synchronous>, transform_indices = @transform_2, window_bounds = array<i64: 1, 256>}, {pipeline_mode = #tpu.pipeline_mode<synchronous>, transform_indices = @transform_3, window_bounds = array<i64: 5, 128, 256>}, {pipeline_mode = #tpu.pipeline_mode<synchronous>, transform_indices = @transform_4, window_bounds = array<i64: 1, 256>}, {pipeline_mode = #tpu.pipeline_mode<synchronous>, transform_indices = @transform_5, window_bounds = array<i64: 4, 128, 128>}, {pipeline_mode = #tpu.pipeline_mode<synchronous>, transform_indices = @transform_6, window_bounds = array<i64: 1, 128>}, {pipeline_mode = #tpu.pipeline_mode<synchronous>, transform_indices = @transform_7, window_bounds = array<i64: 128, 128>}, {pipeline_mode = #tpu.pipeline_mode<synchronous>, transform_indices = @transform_8, window_bounds = array<i64: 1, 128>}, {transform_indices = @transform_9, window_bounds = array<i64: 8, 128>}]} {
    %c0 = arith.constant 0 : index
    %c0_0 = arith.constant 0 : index
    %c0_1 = arith.constant 0 : index
    %0 = vector.load %arg1[%c0, %c0_0, %c0_1] : memref<28x8x128xf32, #tpu.memory_space<vmem>>, vector<28x8x128xf32>
    %cst = arith.constant 0.000000e+00 : f32
    %1 = vector.broadcast %cst : f32 to vector<192x256xf32>
    %2 = vector.extract_strided_slice %0 {offsets = [0, 0, 0], sizes = [24, 8, 128], strides = [1, 1, 1]} : vector<28x8x128xf32> to vector<24x8x128xf32>
    %3 = vector.shape_cast %2 : vector<24x8x128xf32> to vector<192x128xf32>
    %4 = arith.truncf %3 : vector<192x128xf32> to vector<192x128xbf16>
    %c0_2 = arith.constant 0 : index
    %c0_3 = arith.constant 0 : index
    %c0_4 = arith.constant 0 : index
    %5 = vector.load %arg2[%c0_2, %c0_3, %c0_4] : memref<5x128x256xbf16, #tpu.memory_space<vmem>>, vector<1x128x256xbf16>
    %6 = vector.shape_cast %5 : vector<1x128x256xbf16> to vector<128x256xbf16>
    %cst_5 = arith.constant dense<0.000000e+00> : vector<192x256xf32>
    %7 = tpu.matmul %4, %6, %cst_5 {dimension_numbers = #tpu.dot_dimension_numbers<[1], [0], [0], [1], [0, 0, 1, 1], [], []>} : vector<192x128xbf16>, vector<128x256xbf16>, vector<192x256xf32> -> vector<192x256xf32>
    %8 = arith.addf %1, %7 : vector<192x256xf32>
    %9 = vector.extract_strided_slice %0 {offsets = [1, 0, 0], sizes = [24, 8, 128], strides = [1, 1, 1]} : vector<28x8x128xf32> to vector<24x8x128xf32>
    %10 = vector.shape_cast %9 : vector<24x8x128xf32> to vector<192x128xf32>
    %11 = arith.truncf %10 : vector<192x128xf32> to vector<192x128xbf16>
    %c1 = arith.constant 1 : index
    %c0_6 = arith.constant 0 : index
    %c0_7 = arith.constant 0 : index
    %12 = vector.load %arg2[%c1, %c0_6, %c0_7] : memref<5x128x256xbf16, #tpu.memory_space<vmem>>, vector<1x128x256xbf16>
    %13 = vector.shape_cast %12 : vector<1x128x256xbf16> to vector<128x256xbf16>
    %cst_8 = arith.constant dense<0.000000e+00> : vector<192x256xf32>
    %14 = tpu.matmul %11, %13, %cst_8 {dimension_numbers = #tpu.dot_dimension_numbers<[1], [0], [0], [1], [0, 0, 1, 1], [], []>} : vector<192x128xbf16>, vector<128x256xbf16>, vector<192x256xf32> -> vector<192x256xf32>
    %15 = arith.addf %8, %14 : vector<192x256xf32>
    %16 = vector.extract_strided_slice %0 {offsets = [2, 0, 0], sizes = [24, 8, 128], strides = [1, 1, 1]} : vector<28x8x128xf32> to vector<24x8x128xf32>
    %17 = vector.shape_cast %16 : vector<24x8x128xf32> to vector<192x128xf32>
    %18 = arith.truncf %17 : vector<192x128xf32> to vector<192x128xbf16>
    %c2 = arith.constant 2 : index
    %c0_9 = arith.constant 0 : index
    %c0_10 = arith.constant 0 : index
    %19 = vector.load %arg2[%c2, %c0_9, %c0_10] : memref<5x128x256xbf16, #tpu.memory_space<vmem>>, vector<1x128x256xbf16>
    %20 = vector.shape_cast %19 : vector<1x128x256xbf16> to vector<128x256xbf16>
    %cst_11 = arith.constant dense<0.000000e+00> : vector<192x256xf32>
    %21 = tpu.matmul %18, %20, %cst_11 {dimension_numbers = #tpu.dot_dimension_numbers<[1], [0], [0], [1], [0, 0, 1, 1], [], []>} : vector<192x128xbf16>, vector<128x256xbf16>, vector<192x256xf32> -> vector<192x256xf32>
    %22 = arith.addf %15, %21 : vector<192x256xf32>
    %23 = vector.extract_strided_slice %0 {offsets = [3, 0, 0], sizes = [24, 8, 128], strides = [1, 1, 1]} : vector<28x8x128xf32> to vector<24x8x128xf32>
    %24 = vector.shape_cast %23 : vector<24x8x128xf32> to vector<192x128xf32>
    %25 = arith.truncf %24 : vector<192x128xf32> to vector<192x128xbf16>
    %c3 = arith.constant 3 : index
    %c0_12 = arith.constant 0 : index
    %c0_13 = arith.constant 0 : index
    %26 = vector.load %arg2[%c3, %c0_12, %c0_13] : memref<5x128x256xbf16, #tpu.memory_space<vmem>>, vector<1x128x256xbf16>
    %27 = vector.shape_cast %26 : vector<1x128x256xbf16> to vector<128x256xbf16>
    %cst_14 = arith.constant dense<0.000000e+00> : vector<192x256xf32>
    %28 = tpu.matmul %25, %27, %cst_14 {dimension_numbers = #tpu.dot_dimension_numbers<[1], [0], [0], [1], [0, 0, 1, 1], [], []>} : vector<192x128xbf16>, vector<128x256xbf16>, vector<192x256xf32> -> vector<192x256xf32>
    %29 = arith.addf %22, %28 : vector<192x256xf32>
    %30 = vector.extract_strided_slice %0 {offsets = [4, 0, 0], sizes = [24, 8, 128], strides = [1, 1, 1]} : vector<28x8x128xf32> to vector<24x8x128xf32>
    %31 = vector.shape_cast %30 : vector<24x8x128xf32> to vector<192x128xf32>
    %32 = arith.truncf %31 : vector<192x128xf32> to vector<192x128xbf16>
    %c4 = arith.constant 4 : index
    %c0_15 = arith.constant 0 : index
    %c0_16 = arith.constant 0 : index
    %33 = vector.load %arg2[%c4, %c0_15, %c0_16] : memref<5x128x256xbf16, #tpu.memory_space<vmem>>, vector<1x128x256xbf16>
    %34 = vector.shape_cast %33 : vector<1x128x256xbf16> to vector<128x256xbf16>
    %cst_17 = arith.constant dense<0.000000e+00> : vector<192x256xf32>
    %35 = tpu.matmul %32, %34, %cst_17 {dimension_numbers = #tpu.dot_dimension_numbers<[1], [0], [0], [1], [0, 0, 1, 1], [], []>} : vector<192x128xbf16>, vector<128x256xbf16>, vector<192x256xf32> -> vector<192x256xf32>
    %36 = arith.addf %29, %35 : vector<192x256xf32>
    %c0_18 = arith.constant 0 : index
    %c0_19 = arith.constant 0 : index
    %37 = vector.load %arg3[%c0_18, %c0_19] : memref<1x256xf32, #tpu.memory_space<vmem>>, vector<1x256xf32>
    %38 = vector.broadcast %37 : vector<1x256xf32> to vector<192x256xf32>
    %39 = arith.addf %36, %38 : vector<192x256xf32>
    %cst_20 = arith.constant 0.000000e+00 : f32
    %40 = vector.broadcast %cst_20 : f32 to vector<192x256xf32>
    %41 = arith.maximumf %39, %40 : vector<192x256xf32>
    %42 = vector.shape_cast %41 : vector<192x256xf32> to vector<12x16x256xf32>
    %43 = vector.extract_strided_slice %42 {offsets = [0, 0, 0], sizes = [12, 8, 256], strides = [1, 1, 1]} : vector<12x16x256xf32> to vector<12x8x256xf32>
    %44 = vector.extract_strided_slice %42 {offsets = [0, 8, 0], sizes = [12, 8, 256], strides = [1, 1, 1]} : vector<12x16x256xf32> to vector<12x8x256xf32>
    %45 = arith.maximumf %43, %44 : vector<12x8x256xf32>
    %46 = vector.extract_strided_slice %45 {offsets = [0, 0, 0], sizes = [12, 8, 128], strides = [1, 1, 1]} : vector<12x8x256xf32> to vector<12x8x128xf32>
    %47 = vector.extract_strided_slice %45 {offsets = [0, 0, 128], sizes = [12, 8, 128], strides = [1, 1, 1]} : vector<12x8x256xf32> to vector<12x8x128xf32>
    %48 = arith.maximumf %46, %47 : vector<12x8x128xf32>
    %cst_21 = arith.constant 0.000000e+00 : f32
    %49 = vector.broadcast %cst_21 : f32 to vector<64x256xf32>
    %50 = vector.extract_strided_slice %48 {offsets = [0, 0, 0], sizes = [8, 8, 128], strides = [1, 1, 1]} : vector<12x8x128xf32> to vector<8x8x128xf32>
    %51 = vector.shape_cast %50 : vector<8x8x128xf32> to vector<64x128xf32>
    %52 = arith.truncf %51 : vector<64x128xf32> to vector<64x128xbf16>
    %c0_22 = arith.constant 0 : index
    %c0_23 = arith.constant 0 : index
    %c0_24 = arith.constant 0 : index
    %53 = vector.load %arg4[%c0_22, %c0_23, %c0_24] : memref<5x128x256xbf16, #tpu.memory_space<vmem>>, vector<1x128x256xbf16>
    %54 = vector.shape_cast %53 : vector<1x128x256xbf16> to vector<128x256xbf16>
    %cst_25 = arith.constant dense<0.000000e+00> : vector<64x256xf32>
    %55 = tpu.matmul %52, %54, %cst_25 {dimension_numbers = #tpu.dot_dimension_numbers<[1], [0], [0], [1], [0, 0, 1, 1], [], []>} : vector<64x128xbf16>, vector<128x256xbf16>, vector<64x256xf32> -> vector<64x256xf32>
    %56 = arith.addf %49, %55 : vector<64x256xf32>
    %57 = vector.extract_strided_slice %48 {offsets = [1, 0, 0], sizes = [8, 8, 128], strides = [1, 1, 1]} : vector<12x8x128xf32> to vector<8x8x128xf32>
    %58 = vector.shape_cast %57 : vector<8x8x128xf32> to vector<64x128xf32>
    %59 = arith.truncf %58 : vector<64x128xf32> to vector<64x128xbf16>
    %c1_26 = arith.constant 1 : index
    %c0_27 = arith.constant 0 : index
    %c0_28 = arith.constant 0 : index
    %60 = vector.load %arg4[%c1_26, %c0_27, %c0_28] : memref<5x128x256xbf16, #tpu.memory_space<vmem>>, vector<1x128x256xbf16>
    %61 = vector.shape_cast %60 : vector<1x128x256xbf16> to vector<128x256xbf16>
    %cst_29 = arith.constant dense<0.000000e+00> : vector<64x256xf32>
    %62 = tpu.matmul %59, %61, %cst_29 {dimension_numbers = #tpu.dot_dimension_numbers<[1], [0], [0], [1], [0, 0, 1, 1], [], []>} : vector<64x128xbf16>, vector<128x256xbf16>, vector<64x256xf32> -> vector<64x256xf32>
    %63 = arith.addf %56, %62 : vector<64x256xf32>
    %64 = vector.extract_strided_slice %48 {offsets = [2, 0, 0], sizes = [8, 8, 128], strides = [1, 1, 1]} : vector<12x8x128xf32> to vector<8x8x128xf32>
    %65 = vector.shape_cast %64 : vector<8x8x128xf32> to vector<64x128xf32>
    %66 = arith.truncf %65 : vector<64x128xf32> to vector<64x128xbf16>
    %c2_30 = arith.constant 2 : index
    %c0_31 = arith.constant 0 : index
    %c0_32 = arith.constant 0 : index
    %67 = vector.load %arg4[%c2_30, %c0_31, %c0_32] : memref<5x128x256xbf16, #tpu.memory_space<vmem>>, vector<1x128x256xbf16>
    %68 = vector.shape_cast %67 : vector<1x128x256xbf16> to vector<128x256xbf16>
    %cst_33 = arith.constant dense<0.000000e+00> : vector<64x256xf32>
    %69 = tpu.matmul %66, %68, %cst_33 {dimension_numbers = #tpu.dot_dimension_numbers<[1], [0], [0], [1], [0, 0, 1, 1], [], []>} : vector<64x128xbf16>, vector<128x256xbf16>, vector<64x256xf32> -> vector<64x256xf32>
    %70 = arith.addf %63, %69 : vector<64x256xf32>
    %71 = vector.extract_strided_slice %48 {offsets = [3, 0, 0], sizes = [8, 8, 128], strides = [1, 1, 1]} : vector<12x8x128xf32> to vector<8x8x128xf32>
    %72 = vector.shape_cast %71 : vector<8x8x128xf32> to vector<64x128xf32>
    %73 = arith.truncf %72 : vector<64x128xf32> to vector<64x128xbf16>
    %c3_34 = arith.constant 3 : index
    %c0_35 = arith.constant 0 : index
    %c0_36 = arith.constant 0 : index
    %74 = vector.load %arg4[%c3_34, %c0_35, %c0_36] : memref<5x128x256xbf16, #tpu.memory_space<vmem>>, vector<1x128x256xbf16>
    %75 = vector.shape_cast %74 : vector<1x128x256xbf16> to vector<128x256xbf16>
    %cst_37 = arith.constant dense<0.000000e+00> : vector<64x256xf32>
    %76 = tpu.matmul %73, %75, %cst_37 {dimension_numbers = #tpu.dot_dimension_numbers<[1], [0], [0], [1], [0, 0, 1, 1], [], []>} : vector<64x128xbf16>, vector<128x256xbf16>, vector<64x256xf32> -> vector<64x256xf32>
    %77 = arith.addf %70, %76 : vector<64x256xf32>
    %78 = vector.extract_strided_slice %48 {offsets = [4, 0, 0], sizes = [8, 8, 128], strides = [1, 1, 1]} : vector<12x8x128xf32> to vector<8x8x128xf32>
    %79 = vector.shape_cast %78 : vector<8x8x128xf32> to vector<64x128xf32>
    %80 = arith.truncf %79 : vector<64x128xf32> to vector<64x128xbf16>
    %c4_38 = arith.constant 4 : index
    %c0_39 = arith.constant 0 : index
    %c0_40 = arith.constant 0 : index
    %81 = vector.load %arg4[%c4_38, %c0_39, %c0_40] : memref<5x128x256xbf16, #tpu.memory_space<vmem>>, vector<1x128x256xbf16>
    %82 = vector.shape_cast %81 : vector<1x128x256xbf16> to vector<128x256xbf16>
    %cst_41 = arith.constant dense<0.000000e+00> : vector<64x256xf32>
    %83 = tpu.matmul %80, %82, %cst_41 {dimension_numbers = #tpu.dot_dimension_numbers<[1], [0], [0], [1], [0, 0, 1, 1], [], []>} : vector<64x128xbf16>, vector<128x256xbf16>, vector<64x256xf32> -> vector<64x256xf32>
    %84 = arith.addf %77, %83 : vector<64x256xf32>
    %c0_42 = arith.constant 0 : index
    %c0_43 = arith.constant 0 : index
    %85 = vector.load %arg5[%c0_42, %c0_43] : memref<1x256xf32, #tpu.memory_space<vmem>>, vector<1x256xf32>
    %86 = vector.broadcast %85 : vector<1x256xf32> to vector<64x256xf32>
    %87 = arith.addf %84, %86 : vector<64x256xf32>
    %cst_44 = arith.constant 0.000000e+00 : f32
    %88 = vector.broadcast %cst_44 : f32 to vector<64x256xf32>
    %89 = arith.maximumf %87, %88 : vector<64x256xf32>
    %90 = vector.shape_cast %89 : vector<64x256xf32> to vector<4x16x256xf32>
    %91 = vector.extract_strided_slice %90 {offsets = [0, 0, 0], sizes = [4, 8, 256], strides = [1, 1, 1]} : vector<4x16x256xf32> to vector<4x8x256xf32>
    %92 = vector.extract_strided_slice %90 {offsets = [0, 8, 0], sizes = [4, 8, 256], strides = [1, 1, 1]} : vector<4x16x256xf32> to vector<4x8x256xf32>
    %93 = arith.maximumf %91, %92 : vector<4x8x256xf32>
    %94 = vector.extract_strided_slice %93 {offsets = [0, 0, 0], sizes = [4, 8, 128], strides = [1, 1, 1]} : vector<4x8x256xf32> to vector<4x8x128xf32>
    %95 = vector.extract_strided_slice %93 {offsets = [0, 0, 128], sizes = [4, 8, 128], strides = [1, 1, 1]} : vector<4x8x256xf32> to vector<4x8x128xf32>
    %96 = arith.maximumf %94, %95 : vector<4x8x128xf32>
    %cst_45 = arith.constant 0.000000e+00 : f32
    %97 = vector.broadcast %cst_45 : f32 to vector<8x128xf32>
    %98 = vector.extract_strided_slice %96 {offsets = [0, 0, 0], sizes = [1, 8, 128], strides = [1, 1, 1]} : vector<4x8x128xf32> to vector<1x8x128xf32>
    %99 = vector.shape_cast %98 : vector<1x8x128xf32> to vector<8x128xf32>
    %100 = arith.truncf %99 : vector<8x128xf32> to vector<8x128xbf16>
    %c0_46 = arith.constant 0 : index
    %c0_47 = arith.constant 0 : index
    %c0_48 = arith.constant 0 : index
    %101 = vector.load %arg6[%c0_46, %c0_47, %c0_48] : memref<4x128x128xbf16, #tpu.memory_space<vmem>>, vector<1x128x128xbf16>
    %102 = vector.shape_cast %101 : vector<1x128x128xbf16> to vector<128x128xbf16>
    %cst_49 = arith.constant dense<0.000000e+00> : vector<8x128xf32>
    %103 = tpu.matmul %100, %102, %cst_49 {dimension_numbers = #tpu.dot_dimension_numbers<[1], [0], [0], [1], [0, 0, 1, 1], [], []>} : vector<8x128xbf16>, vector<128x128xbf16>, vector<8x128xf32> -> vector<8x128xf32>
    %104 = arith.addf %97, %103 : vector<8x128xf32>
    %105 = vector.extract_strided_slice %96 {offsets = [1, 0, 0], sizes = [1, 8, 128], strides = [1, 1, 1]} : vector<4x8x128xf32> to vector<1x8x128xf32>
    %106 = vector.shape_cast %105 : vector<1x8x128xf32> to vector<8x128xf32>
    %107 = arith.truncf %106 : vector<8x128xf32> to vector<8x128xbf16>
    %c1_50 = arith.constant 1 : index
    %c0_51 = arith.constant 0 : index
    %c0_52 = arith.constant 0 : index
    %108 = vector.load %arg6[%c1_50, %c0_51, %c0_52] : memref<4x128x128xbf16, #tpu.memory_space<vmem>>, vector<1x128x128xbf16>
    %109 = vector.shape_cast %108 : vector<1x128x128xbf16> to vector<128x128xbf16>
    %cst_53 = arith.constant dense<0.000000e+00> : vector<8x128xf32>
    %110 = tpu.matmul %107, %109, %cst_53 {dimension_numbers = #tpu.dot_dimension_numbers<[1], [0], [0], [1], [0, 0, 1, 1], [], []>} : vector<8x128xbf16>, vector<128x128xbf16>, vector<8x128xf32> -> vector<8x128xf32>
    %111 = arith.addf %104, %110 : vector<8x128xf32>
    %112 = vector.extract_strided_slice %96 {offsets = [2, 0, 0], sizes = [1, 8, 128], strides = [1, 1, 1]} : vector<4x8x128xf32> to vector<1x8x128xf32>
    %113 = vector.shape_cast %112 : vector<1x8x128xf32> to vector<8x128xf32>
    %114 = arith.truncf %113 : vector<8x128xf32> to vector<8x128xbf16>
    %c2_54 = arith.constant 2 : index
    %c0_55 = arith.constant 0 : index
    %c0_56 = arith.constant 0 : index
    %115 = vector.load %arg6[%c2_54, %c0_55, %c0_56] : memref<4x128x128xbf16, #tpu.memory_space<vmem>>, vector<1x128x128xbf16>
    %116 = vector.shape_cast %115 : vector<1x128x128xbf16> to vector<128x128xbf16>
    %cst_57 = arith.constant dense<0.000000e+00> : vector<8x128xf32>
    %117 = tpu.matmul %114, %116, %cst_57 {dimension_numbers = #tpu.dot_dimension_numbers<[1], [0], [0], [1], [0, 0, 1, 1], [], []>} : vector<8x128xbf16>, vector<128x128xbf16>, vector<8x128xf32> -> vector<8x128xf32>
    %118 = arith.addf %111, %117 : vector<8x128xf32>
    %119 = vector.extract_strided_slice %96 {offsets = [3, 0, 0], sizes = [1, 8, 128], strides = [1, 1, 1]} : vector<4x8x128xf32> to vector<1x8x128xf32>
    %120 = vector.shape_cast %119 : vector<1x8x128xf32> to vector<8x128xf32>
    %121 = arith.truncf %120 : vector<8x128xf32> to vector<8x128xbf16>
    %c3_58 = arith.constant 3 : index
    %c0_59 = arith.constant 0 : index
    %c0_60 = arith.constant 0 : index
    %122 = vector.load %arg6[%c3_58, %c0_59, %c0_60] : memref<4x128x128xbf16, #tpu.memory_space<vmem>>, vector<1x128x128xbf16>
    %123 = vector.shape_cast %122 : vector<1x128x128xbf16> to vector<128x128xbf16>
    %cst_61 = arith.constant dense<0.000000e+00> : vector<8x128xf32>
    %124 = tpu.matmul %121, %123, %cst_61 {dimension_numbers = #tpu.dot_dimension_numbers<[1], [0], [0], [1], [0, 0, 1, 1], [], []>} : vector<8x128xbf16>, vector<128x128xbf16>, vector<8x128xf32> -> vector<8x128xf32>
    %125 = arith.addf %118, %124 : vector<8x128xf32>
    %c0_62 = arith.constant 0 : index
    %c0_63 = arith.constant 0 : index
    %126 = vector.load %arg7[%c0_62, %c0_63] : memref<1x128xf32, #tpu.memory_space<vmem>>, vector<1x128xf32>
    %127 = vector.broadcast %126 : vector<1x128xf32> to vector<8x128xf32>
    %128 = arith.addf %125, %127 : vector<8x128xf32>
    %cst_64 = arith.constant 0.000000e+00 : f32
    %129 = vector.broadcast %cst_64 : f32 to vector<8x128xf32>
    %130 = arith.maximumf %128, %129 : vector<8x128xf32>
    %131 = arith.truncf %130 : vector<8x128xf32> to vector<8x128xbf16>
    %c0_65 = arith.constant 0 : index
    %c0_66 = arith.constant 0 : index
    %132 = vector.load %arg8[%c0_65, %c0_66] : memref<128x128xbf16, #tpu.memory_space<vmem>>, vector<128x128xbf16>
    %cst_67 = arith.constant dense<0.000000e+00> : vector<8x128xf32>
    %133 = tpu.matmul %131, %132, %cst_67 {dimension_numbers = #tpu.dot_dimension_numbers<[1], [0], [0], [1], [0, 0, 1, 1], [], []>} : vector<8x128xbf16>, vector<128x128xbf16>, vector<8x128xf32> -> vector<8x128xf32>
    %c0_68 = arith.constant 0 : index
    %c0_69 = arith.constant 0 : index
    %134 = vector.load %arg9[%c0_68, %c0_69] : memref<1x128xf32, #tpu.memory_space<vmem>>, vector<1x128xf32>
    %135 = vector.broadcast %134 : vector<1x128xf32> to vector<8x128xf32>
    %136 = arith.addf %133, %135 : vector<8x128xf32>
    %c0_70 = arith.constant 0 : index
    %c0_71 = arith.constant 0 : index
    %137 = vector.load %arg10[%c0_70, %c0_71] : memref<8x128xf32, #tpu.memory_space<vmem>>, vector<8x128xf32>
    tpu.vector_store %arg10[%c0_70, %c0_71], %136 {strides = array<i32>} : memref<8x128xf32, #tpu.memory_space<vmem>>, vector<8x128xf32>,
    return
  }
  func.func @transform_0(%arg0: i32) -> (i32, i32, i32) {
    %c0_i32 = arith.constant 0 : i32
    %c0_i32_0 = arith.constant 0 : i32
    %c0_i32_1 = arith.constant 0 : i32
    return %c0_i32, %arg0, %c0_i32_0 : i32, i32, i32
  }
  func.func @transform_1(%arg0: i32) -> (i32, i32, i32) {
    %c0_i32 = arith.constant 0 : i32
    %c0_i32_0 = arith.constant 0 : i32
    %c0_i32_1 = arith.constant 0 : i32
    %c0_i32_2 = arith.constant 0 : i32
    return %c0_i32, %c0_i32_0, %c0_i32_1 : i32, i32, i32
  }
  func.func @transform_2(%arg0: i32) -> (i32, i32) {
    %c0_i32 = arith.constant 0 : i32
    %c0_i32_0 = arith.constant 0 : i32
    %c0_i32_1 = arith.constant 0 : i32
    return %c0_i32, %c0_i32_0 : i32, i32
  }
  func.func @transform_3(%arg0: i32) -> (i32, i32, i32) {
    %c0_i32 = arith.constant 0 : i32
    %c0_i32_0 = arith.constant 0 : i32
    %c0_i32_1 = arith.constant 0 : i32
    %c0_i32_2 = arith.constant 0 : i32
    return %c0_i32, %c0_i32_0, %c0_i32_1 : i32, i32, i32
  }
  func.func @transform_4(%arg0: i32) -> (i32, i32) {
    %c0_i32 = arith.constant 0 : i32
    %c0_i32_0 = arith.constant 0 : i32
    %c0_i32_1 = arith.constant 0 : i32
    return %c0_i32, %c0_i32_0 : i32, i32
  }
  func.func @transform_5(%arg0: i32) -> (i32, i32, i32) {
    %c0_i32 = arith.constant 0 : i32
    %c0_i32_0 = arith.constant 0 : i32
    %c0_i32_1 = arith.constant 0 : i32
    %c0_i32_2 = arith.constant 0 : i32
    return %c0_i32, %c0_i32_0, %c0_i32_1 : i32, i32, i32
  }
  func.func @transform_6(%arg0: i32) -> (i32, i32) {
    %c0_i32 = arith.constant 0 : i32
    %c0_i32_0 = arith.constant 0 : i32
    %c0_i32_1 = arith.constant 0 : i32
    return %c0_i32, %c0_i32_0 : i32, i32
  }
  func.func @transform_7(%arg0: i32) -> (i32, i32) {
    %c0_i32 = arith.constant 0 : i32
    %c0_i32_0 = arith.constant 0 : i32
    %c0_i32_1 = arith.constant 0 : i32
    return %c0_i32, %c0_i32_0 : i32, i32
  }
  func.func @transform_8(%arg0: i32) -> (i32, i32) {
    %c0_i32 = arith.constant 0 : i32
    %c0_i32_0 = arith.constant 0 : i32
    %c0_i32_1 = arith.constant 0 : i32
    return %c0_i32, %c0_i32_0 : i32, i32
  }
  func.func @transform_9(%arg0: i32) -> (i32, i32) {
    %c0_i32 = arith.constant 0 : i32
    %c0_i32_0 = arith.constant 0 : i32
    return %arg0, %c0_i32 : i32, i32
  }
}

</mosaic_0001>

<bundles_post_ra>
// kernel: simple_cnn_forward.1
= control target key start
LH: loop header
LB: loop body
LE: loop exit
PB: predicated region body
PF: predicated region fallthrough
CT: control target
= control target key end

     0   :  { %v5557_v1 = vmov 0   ;;  %vm3948_vm0 = vmmov 0   ;;  %s5547_s1 = inlined_call_operand.vmem [shape: bf16[5,128,256], index: 1, kind: input, shape index: {}]   ;;  %s5548_s0 = inlined_call_operand.vmem [shape: f32[28,8,128], index: 0, kind: input, shape index: {}]   ;;  %s5549_s3 = inlined_call_operand.vmem [shape: bf16[5,128,256], index: 3, kind: input, shape index: {}]   ;;  %s5550_s2 = inlined_call_operand.vmem [shape: f32[1,256], index: 2, kind: input, shape index: {}]   ;;  %s5551_s5 = inlined_call_operand.vmem [shape: bf16[4,128,128], index: 5, kind: input, shape index: {}]   ;;  %s5552_s4 = inlined_call_operand.vmem [shape: f32[1,256], index: 4, kind: input, shape index: {}]   ;;  %s5553_s7 = inlined_call_operand.vmem [shape: bf16[128,128], index: 7, kind: input, shape index: {}]   ;;  %s5554_s6 = inlined_call_operand.vmem [shape: f32[1,128], index: 6, kind: input, shape index: {}]   ;;  %s5555_s8 = inlined_call_operand.vmem [shape: f32[1,128], index: 8, kind: input, shape index: {}]   ;;  %s5556_s9 = inlined_call_operand.vmem [shape: f32[8,128], index: 9, kind: output, shape index: {}]  }
   0x1   :  { %v3666_v0 = vld [vmem:[%s5547_s1 + $0xf4] ss:$8 sps:$4 sm:$0xff]   ;;  %230 = vmatprep.mubr.bf16.mxu0 %v5557_v1  ;;  %463 = vmatprep.mubr.bf16.mxu1 %v5557_v1  ;;  %v3670_v3 = vld [vmem:[%s5547_s1 + $0xf0] ss:$8 sps:$4 sm:$0xff]   ;;  %v3672_v5 = vld [vmem:[%s5547_s1 + $0xe4] ss:$8 sps:$4 sm:$0xff]  }
   0x2   :  { %v3668_v2 = vld [vmem:[%s5547_s1 + $0x74] ss:$8 sps:$4 sm:$0xff]   ;;  %198 = vmatprep.subr.bf16.mxu0 %v3666_v0  ;;  %v3671_v4 = vld [vmem:[%s5547_s1 + $0x70] ss:$8 sps:$4 sm:$0xff]   ;;  %v3674_v6 = vld [vmem:[%s5547_s1 + $0x64] ss:$8 sps:$4 sm:$0xff]  }
   0x3   :  { %431 = vmatprep.subr.bf16.mxu1 %v3668_v2  ;;  %199 = vmatpush1.bf16.msra.mxu0 %v3670_v3  ;;  %v3676_v7 = vld [vmem:[%s5547_s1 + $0xe0] ss:$8 sps:$4 sm:$0xff]   ;;  %v3678_v9 = vld [vmem:[%s5547_s1 + $0xd4] ss:$8 sps:$4 sm:$0xff]   ;;  %v3682_v11 = vld [vmem:[%s5547_s1 + $0xd0] ss:$8 sps:$4 sm:$0xff]  }
   0x4   :  { %432 = vmatpush1.bf16.msra.mxu1 %v3671_v4  ;;  %200 = vmatprep.subr.bf16.mxu0 %v3672_v5  ;;  %v3677_v8 = vld [vmem:[%s5547_s1 + $0x60] ss:$8 sps:$4 sm:$0xff]   ;;  %v3680_v10 = vld [vmem:[%s5547_s1 + $0x54] ss:$8 sps:$4 sm:$0xff]   ;;  %v3683_v12 = vld [vmem:[%s5547_s1 + $0x50] ss:$8 sps:$4 sm:$0xff]  }
   0x5   :  { %433 = vmatprep.subr.bf16.mxu1 %v3674_v6  ;;  %v3684_v13 = vld [vmem:[%s5547_s1 + $0xc4] ss:$8 sps:$4 sm:$0xff]   ;;  %v3688_v15 = vld [vmem:[%s5547_s1 + $0xc0] ss:$8 sps:$4 sm:$0xff]   ;;  %v3690_v17 = vld [vmem:[%s5547_s1 + $0xb4] ss:$8 sps:$4 sm:$0xff]  }
   0x6   :  { %v3686_v14 = vld [vmem:[%s5547_s1 + $0x44] ss:$8 sps:$4 sm:$0xff]   ;;  %v3689_v16 = vld [vmem:[%s5547_s1 + $0x40] ss:$8 sps:$4 sm:$0xff]   ;;  %v3692_v18 = vld [vmem:[%s5547_s1 + $0x34] ss:$8 sps:$4 sm:$0xff]  }
   0x7   :  { %201 = vmatpush1.bf16.msra.mxu0 %v3676_v7  ;;  %v3694_v19 = vld [vmem:[%s5547_s1 + $0xb0] ss:$8 sps:$4 sm:$0xff]   ;;  %v3696_v21 = vld [vmem:[%s5547_s1 + $0xa4] ss:$8 sps:$4 sm:$0xff]   ;;  %v3700_v23 = vld [vmem:[%s5547_s1 + $0xa0] ss:$8 sps:$4 sm:$0xff]  }
   0x8   :  { %434 = vmatpush1.bf16.msra.mxu1 %v3677_v8  ;;  %202 = vmatprep.subr.bf16.mxu0 %v3678_v9  ;;  %v3695_v20 = vld [vmem:[%s5547_s1 + $0x30] ss:$8 sps:$4 sm:$0xff]   ;;  %v3698_v22 = vld [vmem:[%s5547_s1 + $0x24] ss:$8 sps:$4 sm:$0xff]   ;;  %v3701_v24 = vld [vmem:[%s5547_s1 + $0x20] ss:$8 sps:$4 sm:$0xff]  }
   0x9   :  { %435 = vmatprep.subr.bf16.mxu1 %v3680_v10  ;;  %v3702_v25 = vld [vmem:[%s5547_s1 + $0x94] ss:$8 sps:$4 sm:$0xff]   ;;  %v3706_v27 = vld [vmem:[%s5547_s1 + $0x90] ss:$8 sps:$4 sm:$0xff]   ;;  %v3708_v29 = vld [vmem:[%s5547_s1 + $0x84] ss:$8 sps:$4 sm:$0xff]  }
   0xa   :  { %v3704_v26 = vld [vmem:[%s5547_s1 + $0x14] ss:$8 sps:$4 sm:$0xff]   ;;  %v3707_v28 = vld [vmem:[%s5547_s1 + $0x10] ss:$8 sps:$4 sm:$0xff]   ;;  %v3710_v30 = vld [vmem:[%s5547_s1 + $0x4] ss:$8 sps:$4 sm:$0xff]  }
   0xb   :  { %203 = vmatpush1.bf16.msra.mxu0 %v3682_v11  ;;  %v3712_v31 = vld [vmem:[%s5547_s1 + $0x80] ss:$8 sps:$4 sm:$0xff]   ;;  %v35_v34 = vld [vmem:[%s5548_s0 + $0x10] sm:$0xff]  ;;  %v3719_v40 = vld [vmem:[%s5547_s1 + $0x164] ss:$8 sps:$4 sm:$0xff]  }
   0xc   :  { %436 = vmatpush1.bf16.msra.mxu1 %v3683_v12  ;;  %204 = vmatprep.subr.bf16.mxu0 %v3684_v13  ;;  %v3713_v32 = vld [vmem:[%s5547_s1] ss:$8 sps:$4 sm:$0xff]   ;;  %v3716_v36 = vld [vmem:[%s5547_s1 + $0x174] ss:$8 sps:$4 sm:$0xff]   ;;  %v3714_v39 = vld [vmem:[%s5547_s1 + $0x170] ss:$8 sps:$4 sm:$0xff]  }
   0xd   :  { %437 = vmatprep.subr.bf16.mxu1 %v3686_v14  ;;  %v34_v33 = vld [vmem:[%s5548_s0 + $0x8] sm:$0xff]  ;;  %v33_v35 = vld [vmem:[%s5548_s0] sm:$0xff]  ;;  %v36_v41 = vld [vmem:[%s5548_s0 + $0x18] sm:$0xff] }
   0xe   :  { %v89_v37 = vpack.c.bf16 %v35_v34, %v34_v33  ;;  %v61_v38 = vpack.c.bf16 %v34_v33, %v33_v35  ;;  %v37_v42 = vld [vmem:[%s5548_s0 + $0x20] sm:$0xff]  ;;  %v3732_v44 = vld [vmem:[%s5547_s1 + $0x1f0] ss:$8 sps:$4 sm:$0xff]   ;;  %v3734_v45 = vld [vmem:[%s5547_s1 + $0x1f4] ss:$8 sps:$4 sm:$0xff]   ;;  %v4140_v49 = vpack.c.bf16 %v36_v41, %v35_v34 }
   0xf   :  { %205 = vmatpush1.bf16.msra.mxu0 %v3688_v15  ;;  %v3717_v43 = vld [vmem:[%s5547_s1 + $0x160] ss:$8 sps:$4 sm:$0xff]   ;;  %v3722_v46 = vld [vmem:[%s5547_s1 + $0x154] ss:$8 sps:$4 sm:$0xff]   ;;  %v3737_v47 = vld [vmem:[%s5547_s1 + $0x1e4] ss:$8 sps:$4 sm:$0xff]   ;;  %v4138_v48 = vpack.c.bf16 %v37_v42, %v36_v41 }
  0x10   :  { %438 = vmatpush1.bf16.msra.mxu1 %v3689_v16  ;;  %206 = vmatprep.subr.bf16.mxu0 %v3690_v17  ;;  %v3720_v50 = vld [vmem:[%s5547_s1 + $0x150] ss:$8 sps:$4 sm:$0xff]   ;;  %v3735_v51 = vld [vmem:[%s5547_s1 + $0x1e0] ss:$8 sps:$4 sm:$0xff]   ;;  %v3725_v52 = vld [vmem:[%s5547_s1 + $0x144] ss:$8 sps:$4 sm:$0xff]  }
  0x11   :  { %439 = vmatprep.subr.bf16.mxu1 %v3692_v18  ;;  %v3743_v53 = vld [vmem:[%s5547_s1 + $0x1d4] ss:$8 sps:$4 sm:$0xff]   ;;  %v38_v54 = vld [vmem:[%s5548_s0 + $0x28] sm:$0xff]  ;;  %v3741_v58 = vld [vmem:[%s5547_s1 + $0x1d0] ss:$8 sps:$4 sm:$0xff]  }
  0x12   :  { %v39_v55 = vld [vmem:[%s5548_s0 + $0x30] sm:$0xff]  ;;  %v3723_v56 = vld [vmem:[%s5547_s1 + $0x140] ss:$8 sps:$4 sm:$0xff]   ;;  %v3746_v59 = vld [vmem:[%s5547_s1 + $0x1c4] ss:$8 sps:$4 sm:$0xff]   ;;  %v4178_v61 = vpack.c.bf16 %v38_v54, %v37_v42 }
  0x13   :  { %207 = vmatpush1.bf16.msra.mxu0 %v3694_v19  ;;  %v3728_v57 = vld [vmem:[%s5547_s1 + $0x134] ss:$8 sps:$4 sm:$0xff]   ;;  %v4176_v60 = vpack.c.bf16 %v39_v55, %v38_v54  ;;  %v3726_v62 = vld [vmem:[%s5547_s1 + $0x130] ss:$8 sps:$4 sm:$0xff]   ;;  %v3744_v63 = vld [vmem:[%s5547_s1 + $0x1c0] ss:$8 sps:$4 sm:$0xff]  }
  0x14   :  { %440 = vmatpush1.bf16.msra.mxu1 %v3695_v20  ;;  %208 = vmatprep.subr.bf16.mxu0 %v3696_v21  ;;  %v3731_v0 = vld [vmem:[%s5547_s1 + $0x124] ss:$8 sps:$4 sm:$0xff]   ;;  %v3749_v2 = vld [vmem:[%s5547_s1 + $0x1b4] ss:$8 sps:$4 sm:$0xff]   ;;  %v3729_v5 = vld [vmem:[%s5547_s1 + $0x120] ss:$8 sps:$4 sm:$0xff]  }
  0x15   :  { %441 = vmatprep.subr.bf16.mxu1 %v3698_v22  ;;  %v40_v3 = vld [vmem:[%s5548_s0 + $0x38] sm:$0xff]  ;;  %v41_v4 = vld [vmem:[%s5548_s0 + $0x40] sm:$0xff]  ;;  %v42_v15 = vld [vmem:[%s5548_s0 + $0x48] sm:$0xff] }
  0x16   :  { %v3747_v6 = vld [vmem:[%s5547_s1 + $0x1b0] ss:$8 sps:$4 sm:$0xff]   ;;  %v3740_v7 = vld [vmem:[%s5547_s1 + $0x114] ss:$8 sps:$4 sm:$0xff]   ;;  %v3755_v8 = vld [vmem:[%s5547_s1 + $0x1a4] ss:$8 sps:$4 sm:$0xff]   ;;  %v4214_v9 = vpack.c.bf16 %v41_v4, %v40_v3  ;;  %v4216_v10 = vpack.c.bf16 %v40_v3, %v39_v55  ;;  %v4254_v22 = vpack.c.bf16 %v42_v15, %v41_v4 }
  0x17   :  { %209 = vmatpush1.bf16.msra.mxu0 %v3700_v23  ;;  %v3738_v11 = vld [vmem:[%s5547_s1 + $0x110] ss:$8 sps:$4 sm:$0xff]   ;;  %v3752_v12 = vld [vmem:[%s5547_s1 + $0x104] ss:$8 sps:$4 sm:$0xff]   ;;  %v3753_v13 = vld [vmem:[%s5547_s1 + $0x1a0] ss:$8 sps:$4 sm:$0xff]  }
  0x18   :  { %442 = vmatpush1.bf16.msra.mxu1 %v3701_v24  ;;  %210 = vmatprep.subr.bf16.mxu0 %v3702_v25  ;;  %v3758_v14 = vld [vmem:[%s5547_s1 + $0x194] ss:$8 sps:$4 sm:$0xff]   ;;  %v3750_v17 = vld [vmem:[%s5547_s1 + $0x100] ss:$8 sps:$4 sm:$0xff]   ;;  %v3756_v18 = vld [vmem:[%s5547_s1 + $0x190] ss:$8 sps:$4 sm:$0xff]  }
  0x19   :  { %443 = vmatprep.subr.bf16.mxu1 %v3704_v26  ;;  %v43_v16 = vld [vmem:[%s5548_s0 + $0x50] sm:$0xff]  ;;  %v3761_v19 = vld [vmem:[%s5547_s1 + $0x184] ss:$8 sps:$4 sm:$0xff]   ;;  %v3759_v23 = vld [vmem:[%s5547_s1 + $0x180] ss:$8 sps:$4 sm:$0xff]  }
  0x1a   :  { %v3764_v20 = vld [vmem:[%s5547_s1 + $0x274] ss:$8 sps:$4 sm:$0xff]   ;;  %v4252_v21 = vpack.c.bf16 %v43_v16, %v42_v15  ;;  %v45_v25 = vld [vmem:[%s5548_s0 + $0x60] sm:$0xff]  ;;  %v3762_v54 = vld [vmem:[%s5547_s1 + $0x270] ss:$8 sps:$4 sm:$0xff]  }
  0x1b   :  { %211 = vmatpush1.bf16.msra.mxu0 %v3706_v27  ;;  %v44_v24 = vld [vmem:[%s5548_s0 + $0x58] sm:$0xff]  ;;  %v49_v33 = vld [vmem:[%s5548_s0 + $0x80] sm:$0xff] }
  0x1c   :  { %444 = vmatpush1.bf16.msra.mxu1 %v3707_v28  ;;  %212 = vmatprep.subr.bf16.mxu0 %v3708_v29  ;;  %v4269_v26 = vpack.c.bf16 %v45_v25, %v44_v24  ;;  %v4271_v27 = vpack.c.bf16 %v44_v24, %v43_v16  ;;  %v46_v28 = vld [vmem:[%s5548_s0 + $0x68] sm:$0xff]  ;;  %v47_v29 = vld [vmem:[%s5548_s0 + $0x70] sm:$0xff]  ;;  %v53_v41 = vld [vmem:[%s5548_s0 + $0xa0] sm:$0xff] }
  0x1d   :  { %445 = vmatprep.subr.bf16.mxu1 %v3710_v30  ;;  %v4283_v30 = vpack.c.bf16 %v47_v29, %v46_v28  ;;  %v3767_v55 = vld [vmem:[%s5547_s1 + $0x264] ss:$8 sps:$4 sm:$0xff]   ;;  %v3783_v4 = vld [vmem:[%s5547_s1 + $0x200] ss:$8 sps:$4 sm:$0xff]  }
  0x1e   :  { %v3785_v3 = vld [vmem:[%s5547_s1 + $0x204] ss:$8 sps:$4 sm:$0xff]  }
  0x1f   :  { %213 = vmatpush1.bf16.msra.mxu0 %v3712_v31  ;;  %v4285_v31 = vpack.c.bf16 %v46_v28, %v45_v25 }
  0x20   :  { %446 = vmatpush1.bf16.msra.mxu1 %v3713_v32  ;;  %682 = vmatprep.subr.bf16.mxu0 %v3716_v36  ;;  %v48_v32 = vld [vmem:[%s5548_s0 + $0x78] sm:$0xff]  ;;  %v50_v36 = vld [vmem:[%s5548_s0 + $0x88] sm:$0xff] }
  0x21   :  { %981 = vmatprep.subr.bf16.mxu1 %v3734_v45  ;;  %v4297_v34 = vpack.c.bf16 %v49_v33, %v48_v32  ;;  %v4299_v35 = vpack.c.bf16 %v48_v32, %v47_v29  ;;  %v55_v45 = vld [vmem:[%s5548_s0 + $0xb0] sm:$0xff] }
  0x22   :  { %231 = vmatmul.mubr.bf16.vlgmr.msra.gmra.mxu0 %v89_v37  ;;  %v51_v37 = vld [vmem:[%s5548_s0 + $0x90] sm:$0xff] }
  0x23   :  { %464 = vmatmul.mubr.bf16.vlgmr.msra.gmra.mxu1 %v61_v38  ;;  %683 = vmatpush1.bf16.msra.mxu0 %v3714_v39  ;;  %v4311_v38 = vpack.c.bf16 %v51_v37, %v50_v36  ;;  %v4313_v39 = vpack.c.bf16 %v50_v36, %v49_v33 }
  0x24   :  { %240 = vmatprep.mubr.bf16.mxu0 %v5557_v1  ;;  %473 = vmatprep.mubr.bf16.mxu1 %v5557_v1 }
  0x25   :  { %684 = vmatprep.subr.bf16.mxu0 %v3719_v40  ;;  %982 = vmatpush1.bf16.msra.mxu1 %v3732_v44  ;;  %v52_v40 = vld [vmem:[%s5548_s0 + $0x98] sm:$0xff]  ;;  %v54_v44 = vld [vmem:[%s5548_s0 + $0xa8] sm:$0xff] }
  0x26   :  { %983 = vmatprep.subr.bf16.mxu1 %v3737_v47  ;;  %v4325_v42 = vpack.c.bf16 %v53_v41, %v52_v40  ;;  %v4341_v47 = vpack.c.bf16 %v54_v44, %v53_v41 }
  0x27   :  { %685 = vmatpush1.bf16.msra.mxu0 %v3717_v43  ;;  %v4327_v43 = vpack.c.bf16 %v52_v40, %v51_v37 }
  0x28   :  { %686 = vmatprep.subr.bf16.mxu0 %v3722_v46  ;;  %v4339_v46 = vpack.c.bf16 %v55_v45, %v54_v44 }
  0x29   :  { %984 = vmatpush1.bf16.msra.mxu1 %v3735_v51  ;;  %v4353_v51 = vld [vmem:[%s5548_s0 + $0xc0] sm:$0xff] }
  0x2a   :  { %241 = vmatmul.mubr.bf16.gmra.mxu0 %v4138_v48  ;;  %985 = vmatprep.subr.bf16.mxu1 %v3743_v53 }
  0x2b   :  { %474 = vmatmul.mubr.bf16.gmra.mxu1 %v4140_v49  ;;  %250 = vmatprep.mubr.bf16.mxu0 %v5557_v1 }
  0x2c   :  { %483 = vmatprep.mubr.bf16.mxu1 %v5557_v1  ;;  %687 = vmatpush1.bf16.msra.mxu0 %v3720_v50  ;;  %v56_v50 = vld [vmem:[%s5548_s0 + $0xb8] sm:$0xff] }
  0x2d   :  { %688 = vmatprep.subr.bf16.mxu0 %v3725_v52  ;;  %986 = vmatpush1.bf16.msra.mxu1 %v3741_v58  ;;  %v4356_v52 = vpack.c.bf16 %v4353_v51, %v56_v50  ;;  %v4358_v53 = vpack.c.bf16 %v56_v50, %v55_v45  ;;  %v3771_v58 = vld [vmem:[%s5547_s1 + $0x240] ss:$8 sps:$4 sm:$0xff]  }
  0x2e   :  { %987 = vmatprep.subr.bf16.mxu1 %v3746_v59  ;;  %v3776_v59 = vld [vmem:[%s5547_s1 + $0x234] ss:$8 sps:$4 sm:$0xff]  }
  0x30   :  { %689 = vmatpush1.bf16.msra.mxu0 %v3723_v56  ;;  %v3765_v56 = vld [vmem:[%s5547_s1 + $0x260] ss:$8 sps:$4 sm:$0xff]  }
  0x31   :  { %690 = vmatprep.subr.bf16.mxu0 %v3728_v57  ;;  %988 = vmatpush1.bf16.msra.mxu1 %v3744_v63  ;;  %v3770_v57 = vld [vmem:[%s5547_s1 + $0x254] ss:$8 sps:$4 sm:$0xff]   ;;  %v3777_v63 = vld [vmem:[%s5547_s1 + $0x220] ss:$8 sps:$4 sm:$0xff]  }
  0x32   :  { %251 = vmatmul.mubr.bf16.gmra.mxu0 %v4176_v60  ;;  %989 = vmatprep.subr.bf16.mxu1 %v3749_v2  ;;  %v3780_v2 = vld [vmem:[%s5547_s1 + $0x210] ss:$8 sps:$4 sm:$0xff]  }
  0x33   :  { %484 = vmatmul.mubr.bf16.gmra.mxu1 %v4178_v61  ;;  %260 = vmatprep.mubr.bf16.mxu0 %v5557_v1 }
  0x34   :  { %493 = vmatprep.mubr.bf16.mxu1 %v5557_v1  ;;  %691 = vmatpush1.bf16.msra.mxu0 %v3726_v62  ;;  %v3774_v62 = vld [vmem:[%s5547_s1 + $0x230] ss:$8 sps:$4 sm:$0xff]  }
  0x35   :  { %692 = vmatprep.subr.bf16.mxu0 %v3731_v0  ;;  %990 = vmatpush1.bf16.msra.mxu1 %v3747_v6  ;;  %v3782_v0 = vld [vmem:[%s5547_s1 + $0x214] ss:$8 sps:$4 sm:$0xff]  }
  0x36   :  { %991 = vmatprep.subr.bf16.mxu1 %v3755_v8  ;;  %v4459_v6 = vld [vmem:[%s5548_s0 + $0xd0] sm:$0xff] }
  0x38   :  { %693 = vmatpush1.bf16.msra.mxu0 %v3729_v5  ;;  %v58_v5 = vld [vmem:[%s5548_s0 + $0xc8] sm:$0xff] }
  0x39   :  { %694 = vmatprep.subr.bf16.mxu0 %v3740_v7  ;;  %992 = vmatpush1.bf16.msra.mxu1 %v3753_v13  ;;  %v4462_v7 = vpack.c.bf16 %v58_v5, %v4353_v51  ;;  %v883_v8 = vpack.c.bf16 %v4459_v6, %v58_v5 }
  0x3a   :  { %261 = vmatmul.mubr.bf16.gmra.mxu0 %v4214_v9  ;;  %993 = vmatprep.subr.bf16.mxu1 %v3758_v14 }
  0x3b   :  { %494 = vmatmul.mubr.bf16.gmra.mxu1 %v4216_v10  ;;  %270 = vmatprep.mubr.bf16.mxu0 %v5557_v1 }
  0x3c   :  { %503 = vmatprep.mubr.bf16.mxu1 %v5557_v1  ;;  %695 = vmatpush1.bf16.msra.mxu0 %v3738_v11 }
  0x3d   :  { %696 = vmatprep.subr.bf16.mxu0 %v3752_v12  ;;  %994 = vmatpush1.bf16.msra.mxu1 %v3756_v18 }
  0x3e   :  { %995 = vmatprep.subr.bf16.mxu1 %v3761_v19 }
  0x40   :  { %697 = vmatpush1.bf16.msra.mxu0 %v3750_v17 }
  0x41   :  { %1280 = vmatprep.subr.bf16.mxu0 %v3764_v20  ;;  %996 = vmatpush1.bf16.msra.mxu1 %v3759_v23 }
  0x42   :  { %271 = vmatmul.mubr.bf16.gmra.mxu0 %v4252_v21 }
  0x43   :  { %504 = vmatmul.mubr.bf16.gmra.mxu1 %v4254_v22  ;;  %280 = vmatprep.mubr.bf16.mxu0 %v5557_v1 }
  0x44   :  { %513 = vmatprep.mubr.bf16.mxu1 %v5557_v1 }
  0x4a   :  { %281 = vmatmul.mubr.bf16.gmra.mxu0 %v4269_v26 }
  0x4b   :  { %514 = vmatmul.mubr.bf16.gmra.mxu1 %v4271_v27  ;;  %290 = vmatprep.mubr.bf16.mxu0 %v5557_v1 }
  0x4c   :  { %523 = vmatprep.mubr.bf16.mxu1 %v5557_v1 }
  0x52   :  { %291 = vmatmul.mubr.bf16.gmra.mxu0 %v4283_v30 }
  0x53   :  { %524 = vmatmul.mubr.bf16.gmra.mxu1 %v4285_v31  ;;  %300 = vmatprep.mubr.bf16.mxu0 %v5557_v1 }
  0x54   :  { %533 = vmatprep.mubr.bf16.mxu1 %v5557_v1 }
  0x5a   :  { %301 = vmatmul.mubr.bf16.gmra.mxu0 %v4297_v34 }
  0x5b   :  { %534 = vmatmul.mubr.bf16.gmra.mxu1 %v4299_v35  ;;  %310 = vmatprep.mubr.bf16.mxu0 %v5557_v1 }
  0x5c   :  { %543 = vmatprep.mubr.bf16.mxu1 %v5557_v1 }
  0x62   :  { %311 = vmatmul.mubr.bf16.gmra.mxu0 %v4311_v38 }
  0x63   :  { %544 = vmatmul.mubr.bf16.gmra.mxu1 %v4313_v39  ;;  %320 = vmatprep.mubr.bf16.mxu0 %v5557_v1 }
  0x64   :  { %553 = vmatprep.mubr.bf16.mxu1 %v5557_v1 }
  0x6a   :  { %321 = vmatmul.mubr.bf16.gmra.mxu0 %v4325_v42 }
  0x6b   :  { %554 = vmatmul.mubr.bf16.gmra.mxu1 %v4327_v43  ;;  %330 = vmatprep.mubr.bf16.mxu0 %v5557_v1 }
  0x6c   :  { %563 = vmatprep.mubr.bf16.mxu1 %v5557_v1 }
  0x72   :  { %331 = vmatmul.mubr.bf16.gmra.mxu0 %v4339_v46 }
  0x73   :  { %564 = vmatmul.mubr.bf16.gmra.mxu1 %v4341_v47  ;;  %340 = vmatprep.mubr.bf16.mxu0 %v5557_v1 }
  0x74   :  { %573 = vmatprep.mubr.bf16.mxu1 %v5557_v1 }
  0x7a   :  { %341 = vmatmul.mubr.bf16.gmra.mxu0 %v4356_v52 }
  0x7b   :  { %574 = vmatmul.mubr.bf16.gmra.mxu1 %v4358_v53  ;;  %714 = vmatprep.mubr.bf16.mxu0 %v5557_v1 }
  0x7c   :  { %1013 = vmatprep.mubr.bf16.mxu1 %v5557_v1 }
  0x82   :  { %715 = vmatmul.mubr.bf16.vlgmr.msra.gmra.mxu0 %v4140_v49  ;;  %v3768_v49 = vld [vmem:[%s5547_s1 + $0x250] ss:$8 sps:$4 sm:$0xff]  }
  0x83   :  { %1014 = vmatmul.mubr.bf16.vlgmr.msra.gmra.mxu1 %v4138_v48  ;;  %1281 = vmatpush1.bf16.msra.mxu0 %v3762_v54  ;;  %v3773_v48 = vld [vmem:[%s5547_s1 + $0x244] ss:$8 sps:$4 sm:$0xff]  }
  0x84   :  { %724 = vmatprep.mubr.bf16.mxu0 %v5557_v1  ;;  %1023 = vmatprep.mubr.bf16.mxu1 %v5557_v1 }
  0x85   :  { %1282 = vmatprep.subr.bf16.mxu0 %v3767_v55 }
  0x87   :  { %1283 = vmatpush1.bf16.msra.mxu0 %v3765_v56 }
  0x88   :  { %1284 = vmatprep.subr.bf16.mxu0 %v3770_v57 }
  0x8a   :  { %725 = vmatmul.mubr.bf16.gmra.mxu0 %v4178_v61 }
  0x8b   :  { %1024 = vmatmul.mubr.bf16.gmra.mxu1 %v4176_v60  ;;  %734 = vmatprep.mubr.bf16.mxu0 %v5557_v1  ;;  %v3779_v60 = vld [vmem:[%s5547_s1 + $0x224] ss:$8 sps:$4 sm:$0xff]  }
  0x8c   :  { %1033 = vmatprep.mubr.bf16.mxu1 %v5557_v1  ;;  %1285 = vmatpush1.bf16.msra.mxu0 %v3768_v49  ;;  %v3786_v49 = vld [vmem:[%s5549_s3 + $0xf0] ss:$8 sps:$4 sm:$0xff]  }
  0x8d   :  { %1286 = vmatprep.subr.bf16.mxu0 %v3773_v48 }
  0x90   :  { %1287 = vmatpush1.bf16.msra.mxu0 %v3771_v58 }
  0x91   :  { %1288 = vmatprep.subr.bf16.mxu0 %v3776_v59 }
  0x92   :  { %735 = vmatmul.mubr.bf16.gmra.mxu0 %v4216_v10 }
  0x93   :  { %1034 = vmatmul.mubr.bf16.gmra.mxu1 %v4214_v9  ;;  %744 = vmatprep.mubr.bf16.mxu0 %v5557_v1 }
  0x94   :  { %1043 = vmatprep.mubr.bf16.mxu1 %v5557_v1  ;;  %1289 = vmatpush1.bf16.msra.mxu0 %v3774_v62 }
  0x95   :  { %1290 = vmatprep.subr.bf16.mxu0 %v3779_v60 }
  0x98   :  { %1291 = vmatpush1.bf16.msra.mxu0 %v3777_v63 }
  0x99   :  { %1292 = vmatprep.subr.bf16.mxu0 %v3782_v0 }
  0x9a   :  { %745 = vmatmul.mubr.bf16.gmra.mxu0 %v4254_v22 }
  0x9b   :  { %1044 = vmatmul.mubr.bf16.gmra.mxu1 %v4252_v21  ;;  %754 = vmatprep.mubr.bf16.mxu0 %v5557_v1 }
  0x9c   :  { %1053 = vmatprep.mubr.bf16.mxu1 %v5557_v1  ;;  %1293 = vmatpush1.bf16.msra.mxu0 %v3780_v2 }
  0x9d   :  { %1294 = vmatprep.subr.bf16.mxu0 %v3785_v3 }
  0xa0   :  { %1295 = vmatpush1.bf16.msra.mxu0 %v3783_v4 }
  0xa2   :  { %755 = vmatmul.mubr.bf16.gmra.mxu0 %v4271_v27 }
  0xa3   :  { %1054 = vmatmul.mubr.bf16.gmra.mxu1 %v4269_v26  ;;  %764 = vmatprep.mubr.bf16.mxu0 %v5557_v1 }
  0xa4   :  { %1063 = vmatprep.mubr.bf16.mxu1 %v5557_v1 }
  0xaa   :  { %765 = vmatmul.mubr.bf16.gmra.mxu0 %v4285_v31 }
  0xab   :  { %1064 = vmatmul.mubr.bf16.gmra.mxu1 %v4283_v30  ;;  %774 = vmatprep.mubr.bf16.mxu0 %v5557_v1 }
  0xac   :  { %1073 = vmatprep.mubr.bf16.mxu1 %v5557_v1 }
  0xb2   :  { %775 = vmatmul.mubr.bf16.gmra.mxu0 %v4299_v35 }
  0xb3   :  { %1074 = vmatmul.mubr.bf16.gmra.mxu1 %v4297_v34  ;;  %784 = vmatprep.mubr.bf16.mxu0 %v5557_v1 }
  0xb4   :  { %1083 = vmatprep.mubr.bf16.mxu1 %v5557_v1 }
  0xba   :  { %785 = vmatmul.mubr.bf16.gmra.mxu0 %v4313_v39 }
  0xbb   :  { %1084 = vmatmul.mubr.bf16.gmra.mxu1 %v4311_v38  ;;  %794 = vmatprep.mubr.bf16.mxu0 %v5557_v1 }
  0xbc   :  { %1093 = vmatprep.mubr.bf16.mxu1 %v5557_v1 }
  0xc2   :  { %795 = vmatmul.mubr.bf16.gmra.mxu0 %v4327_v43 }
  0xc3   :  { %1094 = vmatmul.mubr.bf16.gmra.mxu1 %v4325_v42  ;;  %804 = vmatprep.mubr.bf16.mxu0 %v5557_v1 }
  0xc4   :  { %1103 = vmatprep.mubr.bf16.mxu1 %v5557_v1 }
  0xca   :  { %805 = vmatmul.mubr.bf16.gmra.mxu0 %v4341_v47 }
  0xcb   :  { %1104 = vmatmul.mubr.bf16.gmra.mxu1 %v4339_v46  ;;  %814 = vmatprep.mubr.bf16.mxu0 %v5557_v1 }
  0xcc   :  { %1113 = vmatprep.mubr.bf16.mxu1 %v5557_v1 }
  0xd2   :  { %815 = vmatmul.mubr.bf16.gmra.mxu0 %v4358_v53 }
  0xd3   :  { %1114 = vmatmul.mubr.bf16.gmra.mxu1 %v4356_v52  ;;  %824 = vmatprep.mubr.bf16.mxu0 %v5557_v1 }
  0xd4   :  { %1123 = vmatprep.mubr.bf16.mxu1 %v5557_v1 }
  0xda   :  { %825 = vmatmul.mubr.bf16.gmra.mxu0 %v4462_v7 }
  0xdb   :  { %1124 = vmatmul.mubr.bf16.gmra.mxu1 %v883_v8  ;;  %1312 = vmatprep.mubr.bf16.mxu0 %v5557_v1 }
  0xdc   :  { %1778 = vmatprep.mubr.bf16.mxu1 %v5557_v1 }
  0xe2   :  { %v232_v9 = vpop.f32.mrf.mxu0  ;;  %1313 = vmatmul.mubr.bf16.vlgmr.msra.gmra.mxu0 %v4178_v61 }
  0xe3   :  { %v465_v11 = vpop.f32.mrf.mxu1  ;;  %1322 = vmatprep.mubr.bf16.mxu0 %v5557_v1 }
  0xe4   :  { %v4469_v12 = vadd.f32 %v465_v11, %v232_v9  ;;  %v234_v13 = vpop.f32.mrf.mxu0 }
  0xe5   :  { %v467_v14 = vpop.f32.mrf.mxu1 }
  0xe6   :  { %v4472_v15 = vadd.f32 %v467_v14, %v234_v13  ;;  %v236_v16 = vpop.f32.mrf.mxu0  ;;  %v3791_v13 = vld [vmem:[%s5549_s3 + $0xe4] ss:$8 sps:$4 sm:$0xff]  }
  0xe7   :  { %v469_v17 = vpop.f32.mrf.mxu1 }
  0xe8   :  { %v4474_v18 = vadd.f32 %v469_v17, %v236_v16  ;;  %v4476_v19 = vpop.f32.mrf.mxu0 }
  0xe9   :  { %v4478_v20 = vpop.f32.mrf.mxu1 }
  0xea   :  { %v242_v21 = vpop.f32.mrf.mxu0  ;;  %1323 = vmatmul.mubr.bf16.gmra.mxu0 %v4216_v10 }
  0xeb   :  { %v475_v23 = vpop.f32.mrf.mxu1  ;;  %1332 = vmatprep.mubr.bf16.mxu0 %v5557_v1 }
  0xec   :  { %v4481_v61 = vadd.f32 %v475_v23, %v242_v21  ;;  %v244_v24 = vpop.f32.mrf.mxu0 }
  0xed   :  { %v477_v25 = vpop.f32.mrf.mxu1 }
  0xee   :  { %v4484_v26 = vadd.f32 %v477_v25, %v244_v24  ;;  %v246_v28 = vpop.f32.mrf.mxu0 }
  0xef   :  { %v479_v29 = vpop.f32.mrf.mxu1 }
  0xf0   :  { %v4486_v30 = vadd.f32 %v479_v29, %v246_v28  ;;  %v4488_v32 = vpop.f32.mrf.mxu0 }
  0xf1   :  { %v4490_v33 = vpop.f32.mrf.mxu1 }
  0xf2   :  { %v252_v34 = vpop.f32.mrf.mxu0  ;;  %1333 = vmatmul.mubr.bf16.gmra.mxu0 %v4254_v22 }
  0xf3   :  { %v485_v36 = vpop.f32.mrf.mxu1  ;;  %1342 = vmatprep.mubr.bf16.mxu0 %v5557_v1 }
  0xf4   :  { %v4493_v10 = vadd.f32 %v485_v36, %v252_v34  ;;  %v254_v37 = vpop.f32.mrf.mxu0 }
  0xf5   :  { %v487_v38 = vpop.f32.mrf.mxu1 }
  0xf6   :  { %v4496_v40 = vadd.f32 %v487_v38, %v254_v37  ;;  %v256_v41 = vpop.f32.mrf.mxu0 }
  0xf7   :  { %v489_v42 = vpop.f32.mrf.mxu1 }
  0xf8   :  { %v4498_v44 = vadd.f32 %v489_v42, %v256_v41  ;;  %v4500_v45 = vpop.f32.mrf.mxu0 }
  0xf9   :  { %5563 = vst [vmem:[#allocation2_spill] sm:$0xff] %v4500_v45  ;;  %v4502_v46 = vpop.f32.mrf.mxu1 }
  0xfa   :  { %5564 = vst [vmem:[#allocation3_spill] sm:$0xff] %v4502_v46  ;;  %v262_v50 = vpop.f32.mrf.mxu0  ;;  %1343 = vmatmul.mubr.bf16.gmra.mxu0 %v4271_v27  ;;  %v3788_v27 = vld [vmem:[%s5549_s3 + $0xf4] ss:$8 sps:$4 sm:$0xff]  }
  0xfb   :  { %v495_v51 = vpop.f32.mrf.mxu1  ;;  %1352 = vmatprep.mubr.bf16.mxu0 %v5557_v1  ;;  %1746 = vmatprep.subr.bf16.mxu1 %v3788_v27 }
  0xfc   :  { %v4505_v22 = vadd.f32 %v495_v51, %v262_v50  ;;  %v264_v52 = vpop.f32.mrf.mxu0  ;;  %1747 = vmatpush1.bf16.msra.mxu1 %v3786_v49  ;;  %v3792_v51 = vld [vmem:[%s5549_s3 + $0xd0] ss:$8 sps:$4 sm:$0xff]  }
  0xfd   :  { %v497_v54 = vpop.f32.mrf.mxu1  ;;  %1748 = vmatprep.subr.bf16.mxu1 %v3791_v13 }
  0xfe   :  { %v4508_v55 = vadd.f32 %v497_v54, %v264_v52  ;;  %v266_v56 = vpop.f32.mrf.mxu0  ;;  %v3794_v52 = vld [vmem:[%s5549_s3 + $0xd4] ss:$8 sps:$4 sm:$0xff]  }
  0xff   :  { %v499_v57 = vpop.f32.mrf.mxu1 }
 0x100   :  { %v4513_v48 = vadd.f32 %v499_v57, %v266_v56  ;;  %v4518_v58 = vpop.f32.mrf.mxu0 }
 0x101   :  { %v4520_v59 = vpop.f32.mrf.mxu1 }
 0x102   :  { %v272_v62 = vpop.f32.mrf.mxu0  ;;  %1353 = vmatmul.mubr.bf16.gmra.mxu0 %v4285_v31  ;;  %v3789_v31 = vld [vmem:[%s5549_s3 + $0xe0] ss:$8 sps:$4 sm:$0xff]  }
 0x103   :  { %v505_v60 = vpop.f32.mrf.mxu1  ;;  %1362 = vmatprep.mubr.bf16.mxu0 %v5557_v1  ;;  %1749 = vmatpush1.bf16.msra.mxu1 %v3789_v31 }
 0x104   :  { %v4523_v63 = vadd.f32 %v505_v60, %v272_v62  ;;  %v274_v0 = vpop.f32.mrf.mxu0  ;;  %1750 = vmatprep.subr.bf16.mxu1 %v3794_v52 }
 0x105   :  { %v507_v2 = vpop.f32.mrf.mxu1 }
 0x106   :  { %v4526_v3 = vadd.f32 %v507_v2, %v274_v0  ;;  %v276_v4 = vpop.f32.mrf.mxu0 }
 0x107   :  { %v509_v5 = vpop.f32.mrf.mxu1  ;;  %1751 = vmatpush1.bf16.msra.mxu1 %v3792_v51 }
 0x108   :  { %v4528_v8 = vadd.f32 %v509_v5, %v276_v4  ;;  %v4530_v9 = vpop.f32.mrf.mxu0 }
 0x109   :  { %v4532_v11 = vpop.f32.mrf.mxu1 }
 0x10a   :  { %v282_v14 = vpop.f32.mrf.mxu0  ;;  %1363 = vmatmul.mubr.bf16.gmra.mxu0 %v4299_v35 }
 0x10b   :  { %v515_v16 = vpop.f32.mrf.mxu1  ;;  %1372 = vmatprep.mubr.bf16.mxu0 %v5557_v1 }
 0x10c   :  { %v4541_v17 = vadd.f32 %v515_v16, %v282_v14  ;;  %v284_v21 = vpop.f32.mrf.mxu0 }
 0x10d   :  { %v517_v23 = vpop.f32.mrf.mxu1 }
 0x10e   :  { %v4544_v24 = vadd.f32 %v517_v23, %v284_v21  ;;  %v286_v25 = vpop.f32.mrf.mxu0  ;;  %v3797_v21 = vld [vmem:[%s5549_s3 + $0xc4] ss:$8 sps:$4 sm:$0xff]  }
 0x10f   :  { %v519_v28 = vpop.f32.mrf.mxu1  ;;  %1752 = vmatprep.subr.bf16.mxu1 %v3797_v21 }
 0x110   :  { %v4546_v29 = vadd.f32 %v519_v28, %v286_v25  ;;  %v4548_v34 = vpop.f32.mrf.mxu0 }
 0x111   :  { %v4550_v36 = vpop.f32.mrf.mxu1 }
 0x112   :  { %v292_v37 = vpop.f32.mrf.mxu0  ;;  %1373 = vmatmul.mubr.bf16.gmra.mxu0 %v4313_v39 }
 0x113   :  { %v525_v35 = vpop.f32.mrf.mxu1  ;;  %1382 = vmatprep.mubr.bf16.mxu0 %v5557_v1 }
 0x114   :  { %v4553_v38 = vadd.f32 %v525_v35, %v292_v37  ;;  %v294_v41 = vpop.f32.mrf.mxu0 }
 0x115   :  { %v527_v42 = vpop.f32.mrf.mxu1 }
 0x116   :  { %v4556_v50 = vadd.f32 %v527_v42, %v294_v41  ;;  %v296_v54 = vpop.f32.mrf.mxu0 }
 0x117   :  { %v529_v56 = vpop.f32.mrf.mxu1 }
 0x118   :  { %v4564_v57 = vadd.f32 %v529_v56, %v296_v54  ;;  %v4566_v39 = vpop.f32.mrf.mxu0 }
 0x119   :  { %v4568_v49 = vpop.f32.mrf.mxu1 }
 0x11a   :  { %v302_v27 = vpop.f32.mrf.mxu0  ;;  %1383 = vmatmul.mubr.bf16.gmra.mxu0 %v4327_v43  ;;  %v3795_v43 = vld [vmem:[%s5549_s3 + $0xc0] ss:$8 sps:$4 sm:$0xff]  }
 0x11b   :  { %v535_v62 = vpop.f32.mrf.mxu1  ;;  %1392 = vmatprep.mubr.bf16.mxu0 %v5557_v1  ;;  %1753 = vmatpush1.bf16.msra.mxu1 %v3795_v43 }
 0x11c   :  { %v4571_v60 = vadd.f32 %v535_v62, %v302_v27  ;;  %v304_v0 = vpop.f32.mrf.mxu0 }
 0x11d   :  { %v537_v2 = vpop.f32.mrf.mxu1 }
 0x11e   :  { %v4574_v4 = vadd.f32 %v537_v2, %v304_v0  ;;  %v306_v5 = vpop.f32.mrf.mxu0 }
 0x11f   :  { %v539_v31 = vpop.f32.mrf.mxu1 }
 0x120   :  { %v4576_v13 = vadd.f32 %v539_v31, %v306_v5  ;;  %v4578_v14 = vpop.f32.mrf.mxu0 }
 0x121   :  { %v4580_v16 = vpop.f32.mrf.mxu1 }
 0x122   :  { %v312_v23 = vpop.f32.mrf.mxu0  ;;  %1393 = vmatmul.mubr.bf16.gmra.mxu0 %v4341_v47 }
 0x123   :  { %v545_v25 = vpop.f32.mrf.mxu1  ;;  %1402 = vmatprep.mubr.bf16.mxu0 %v5557_v1 }
 0x124   :  { %v4589_v28 = vadd.f32 %v545_v25, %v312_v23  ;;  %v314_v37 = vpop.f32.mrf.mxu0 }
 0x125   :  { %v547_v35 = vpop.f32.mrf.mxu1 }
 0x126   :  { %v4592_v41 = vadd.f32 %v547_v35, %v314_v37  ;;  %v316_v42 = vpop.f32.mrf.mxu0  ;;  %v3800_v37 = vld [vmem:[%s5549_s3 + $0xb4] ss:$8 sps:$4 sm:$0xff]  }
 0x127   :  { %v549_v51 = vpop.f32.mrf.mxu1  ;;  %1754 = vmatprep.subr.bf16.mxu1 %v3800_v37 }
 0x128   :  { %v4594_v52 = vadd.f32 %v549_v51, %v316_v42  ;;  %v4596_v54 = vpop.f32.mrf.mxu0  ;;  %v60_v51 = vld [vmem:[%s5548_s0 + $0xd8] sm:$0xff] }
 0x129   :  { %5565 = vst [vmem:[#allocation4_spill] sm:$0xff] %v4596_v54  ;;  %v4598_v56 = vpop.f32.mrf.mxu1 }
 0x12a   :  { %5566 = vst [vmem:[#allocation5_spill] sm:$0xff] %v4598_v56  ;;  %v322_v27 = vpop.f32.mrf.mxu0  ;;  %1403 = vmatmul.mubr.bf16.gmra.mxu0 %v4358_v53  ;;  %v3798_v53 = vld [vmem:[%s5549_s3 + $0xb0] ss:$8 sps:$4 sm:$0xff]   ;;  %v3821_v56 = vld [vmem:[%s5549_s3 + $0x1c4] ss:$8 sps:$4 sm:$0xff]  }
 0x12b   :  { %v555_v47 = vpop.f32.mrf.mxu1  ;;  %1412 = vmatprep.mubr.bf16.mxu0 %v5557_v1  ;;  %1755 = vmatpush1.bf16.msra.mxu1 %v3798_v53  ;;  %v3809_v53 = vld [vmem:[%s5549_s3 + $0x1e4] ss:$8 sps:$4 sm:$0xff]  }
 0x12c   :  { %v4601_v62 = vadd.f32 %v555_v47, %v322_v27  ;;  %v324_v0 = vpop.f32.mrf.mxu0  ;;  %v3803_v47 = vld [vmem:[%s5549_s3 + $0x1f4] ss:$8 sps:$4 sm:$0xff]  }
 0x12d   :  { %v557_v2 = vpop.f32.mrf.mxu1  ;;  %2257 = vmatprep.subr.bf16.mxu0 %v3803_v47 }
 0x12e   :  { %v4604_v5 = vadd.f32 %v557_v2, %v324_v0  ;;  %v326_v31 = vpop.f32.mrf.mxu0 }
 0x12f   :  { %v559_v43 = vpop.f32.mrf.mxu1 }
 0x130   :  { %v4606_v21 = vadd.f32 %v559_v43, %v326_v31  ;;  %v4608_v23 = vpop.f32.mrf.mxu0  ;;  %v1182_v43 = vpack.c.bf16 %v60_v51, %v4459_v6  ;;  %v3804_v6 = vld [vmem:[%s5549_s3 + $0xa0] ss:$8 sps:$4 sm:$0xff]  }
 0x131   :  { %5567 = vst [vmem:[#allocation6_spill] sm:$0xff] %v4608_v23  ;;  %v4610_v25 = vpop.f32.mrf.mxu1  ;;  %v3807_v51 = vld [vmem:[%s5549_s3 + $0x1e0] ss:$8 sps:$4 sm:$0xff]   ;;  %v3818_v23 = vld [vmem:[%s5549_s3 + $0x84] ss:$8 sps:$4 sm:$0xff]  }
 0x132   :  { %5568 = vst [vmem:[#allocation7_spill] sm:$0xff] %v4610_v25  ;;  %v332_v35 = vpop.f32.mrf.mxu0  ;;  %1413 = vmatmul.mubr.bf16.gmra.mxu0 %v4462_v7  ;;  %v3801_v7 = vld [vmem:[%s5549_s3 + $0x1f0] ss:$8 sps:$4 sm:$0xff]  }
 0x133   :  { %v565_v42 = vpop.f32.mrf.mxu1  ;;  %1422 = vmatprep.mubr.bf16.mxu0 %v5557_v1  ;;  %2258 = vmatpush1.bf16.msra.mxu0 %v3801_v7  ;;  %v3806_v1 = vld [vmem:[%s5549_s3 + $0xa4] ss:$8 sps:$4 sm:$0xff]  }
 0x134   :  { %v4622_v27 = vadd.f32 %v565_v42, %v332_v35  ;;  %v334_v0 = vpop.f32.mrf.mxu0  ;;  %1756 = vmatprep.subr.bf16.mxu1 %v3806_v1  ;;  %2259 = vmatprep.subr.bf16.mxu0 %v3809_v53  ;;  %v3813_v53 = vld [vmem:[%s5549_s3 + $0x1d0] ss:$8 sps:$4 sm:$0xff]  }
 0x135   :  { %v567_v2 = vpop.f32.mrf.mxu1  ;;  %1757 = vmatpush1.bf16.msra.mxu1 %v3804_v6 }
 0x136   :  { %v4631_v31 = vadd.f32 %v567_v2, %v334_v0  ;;  %v336_v35 = vpop.f32.mrf.mxu0 }
 0x137   :  { %v569_v42 = vpop.f32.mrf.mxu1  ;;  %2260 = vmatpush1.bf16.msra.mxu0 %v3807_v51 }
 0x138   :  { %v4634_v37 = vadd.f32 %v569_v42, %v336_v35  ;;  %v4642_v25 = vpop.f32.mrf.mxu0  ;;  %v3812_v35 = vld [vmem:[%s5549_s3 + $0x94] ss:$8 sps:$4 sm:$0xff]  }
 0x139   :  { %5569 = vst [vmem:[#allocation8_spill] sm:$0xff] %v4642_v25  ;;  %v4644_v0 = vpop.f32.mrf.mxu1  ;;  %v3815_v42 = vld [vmem:[%s5549_s3 + $0x1d4] ss:$8 sps:$4 sm:$0xff]   ;;  %1758 = vmatprep.subr.bf16.mxu1 %v3812_v35  ;;  %v3816_v35 = vld [vmem:[%s5549_s3 + $0x80] ss:$8 sps:$4 sm:$0xff]  }
 0x13a   :  { %5570 = vst [vmem:[#allocation9_spill] sm:$0xff] %v4644_v0  ;;  %v342_v47 = vpop.f32.mrf.mxu0  ;;  %1423 = vmatmul.mubr.bf16.gmra.mxu0 %v1182_v43  ;;  %v5571_v0 = vmov 0   ;;  %v3810_v43 = vld [vmem:[%s5549_s3 + $0x90] ss:$8 sps:$4 sm:$0xff]   ;;  %2261 = vmatprep.subr.bf16.mxu0 %v3815_v42  ;;  %v3819_v42 = vld [vmem:[%s5549_s3 + $0x1c0] ss:$8 sps:$4 sm:$0xff]  }
 0x13b   :  { %v575_v2 = vpop.f32.mrf.mxu1  ;;  %2289 = vmatprep.mubr.bf16.mxu0 %v5571_v0  ;;  %1759 = vmatpush1.bf16.msra.mxu1 %v3810_v43 }
 0x13c   :  { %v4652_v7 = vadd.f32 %v575_v2, %v342_v47  ;;  %v344_v25 = vpop.f32.mrf.mxu0  ;;  %2262 = vmatpush1.bf16.msra.mxu0 %v3813_v53  ;;  %1760 = vmatprep.subr.bf16.mxu1 %v3818_v23 }
 0x13d   :  { %v577_v1 = vpop.f32.mrf.mxu1  ;;  %2263 = vmatprep.subr.bf16.mxu0 %v3821_v56 }
 0x13e   :  { %v4667_v6 = vadd.f32 %v577_v1, %v344_v25  ;;  %v346_v51 = vpop.f32.mrf.mxu0 }
 0x13f   :  { %v579_v47 = vpop.f32.mrf.mxu1  ;;  %1761 = vmatpush1.bf16.msra.mxu1 %v3816_v35 }
 0x140   :  { %v4669_v2 = vadd.f32 %v579_v47, %v346_v51  ;;  %v4677_v54 = vpop.f32.mrf.mxu0  ;;  %2264 = vmatpush1.bf16.msra.mxu0 %v3819_v42  ;;  %v3824_v51 = vld [vmem:[%s5549_s3 + $0x1b4] ss:$8 sps:$4 sm:$0xff]  }
 0x141   :  { %5572 = vst [vmem:[#allocation10_spill] sm:$0xff] %v4677_v54  ;;  %v4679_v25 = vpop.f32.mrf.mxu1  ;;  %v3822_v54 = vld [vmem:[%s5549_s3 + $0x1b0] ss:$8 sps:$4 sm:$0xff]   ;;  %2265 = vmatprep.subr.bf16.mxu0 %v3824_v51 }
 0x142   :  { %5573 = vst [vmem:[#allocation11_spill] sm:$0xff] %v4679_v25  ;;  %v716_v1 = vpop.f32.mrf.mxu0 }
 0x143   :  { %v1015_v43 = vpop.f32.mrf.mxu1  ;;  %v835_v53 = vadd.f32 %v716_v1, %v4469_v12  ;;  %v3827_v1 = vld [vmem:[%s5549_s3 + $0x1a4] ss:$8 sps:$4 sm:$0xff]  }
 0x144   :  { %v718_v47 = vpop.f32.mrf.mxu0  ;;  %2266 = vmatpush1.bf16.msra.mxu0 %v3822_v54 }
 0x145   :  { %v1017_v25 = vpop.f32.mrf.mxu1  ;;  %v836_v0 = vadd.f32 %v718_v47, %v4472_v15  ;;  %v4695_v23 = vadd.f32 %v1015_v43, %v835_v53  ;;  %v3825_v15 = vld [vmem:[%s5549_s3 + $0x1a0] ss:$8 sps:$4 sm:$0xff]   ;;  %2267 = vmatprep.subr.bf16.mxu0 %v3827_v1 }
 0x146   :  { %v720_v56 = vpop.f32.mrf.mxu0 }
 0x147   :  { %v1019_v35 = vpop.f32.mrf.mxu1  ;;  %v837_v12 = vadd.f32 %v720_v56, %v4474_v18  ;;  %v4698_v42 = vadd.f32 %v1017_v25, %v836_v0  ;;  %v3830_v18 = vld [vmem:[%s5549_s3 + $0x194] ss:$8 sps:$4 sm:$0xff]   ;;  %v3828_v25 = vld [vmem:[%s5549_s3 + $0x190] ss:$8 sps:$4 sm:$0xff]  }
 0x148   :  { %v4703_v46 = vpop.f32.mrf.mxu0  ;;  %2268 = vmatpush1.bf16.msra.mxu0 %v3825_v15  ;;  %v3831_v15 = vld [vmem:[%s5549_s3 + $0x180] ss:$8 sps:$4 sm:$0xff]  }
 0x149   :  { %v4708_v43 = vadd.f32 %v1019_v35, %v837_v12  ;;  %v4716_v54 = vpop.f32.mrf.mxu1  ;;  %2269 = vmatprep.subr.bf16.mxu0 %v3830_v18  ;;  %v3833_v35 = vld [vmem:[%s5549_s3 + $0x184] ss:$8 sps:$4 sm:$0xff]  }
 0x14a   :  { %v726_v53 = vpop.f32.mrf.mxu0 }
 0x14b   :  { %v4711_v51 = vadd.f32 %v726_v53, %v4481_v61  ;;  %v4730_v12 = vpop.f32.mrf.mxu1 }
 0x14c   :  { %v728_v0 = vpop.f32.mrf.mxu0  ;;  %2270 = vmatpush1.bf16.msra.mxu0 %v3828_v25 }
 0x14d   :  { %v4722_v47 = vadd.f32 %v728_v0, %v4484_v26  ;;  %2271 = vmatprep.subr.bf16.mxu0 %v3833_v35 }
 0x14e   :  { %v730_v56 = vpop.f32.mrf.mxu0 }
 0x14f   :  { %v4725_v61 = vadd.f32 %v730_v56, %v4486_v30  ;;  %v4740_v30 = vpop.f32.mrf.mxu1 }
 0x150   :  { %v4732_v1 = vpop.f32.mrf.mxu0  ;;  %2272 = vmatpush1.bf16.msra.mxu0 %v3831_v15 }
 0x151   :  { %5574 = vst [vmem:[#allocation12_spill] sm:$0xff] %v4725_v61  ;;  %5575 = vst [vmem:[#allocation13_spill] sm:$0xff] %v4732_v1  ;;  %v4748_v45 = vpop.f32.mrf.mxu1 }
 0x152   :  { %v736_v26 = vpop.f32.mrf.mxu0 }
 0x153   :  { %v4738_v53 = vadd.f32 %v736_v26, %v4493_v10  ;;  %v3836_v10 = vld [vmem:[%s5549_s3 + $0x74] ss:$8 sps:$4 sm:$0xff]   ;;  %v4758_v15 = vpop.f32.mrf.mxu1 }
 0x154   :  { %v738_v18 = vpop.f32.mrf.mxu0  ;;  %1899 = vmatprep.subr.bf16.mxu1 %v3836_v10 }
 0x155   :  { %v4743_v0 = vadd.f32 %v738_v18, %v4496_v40  ;;  %v502_v18 = vadd.f32 %v4520_v59, %v4518_v58 }
 0x156   :  { %v740_v25 = vpop.f32.mrf.mxu0 }
 0x157   :  { %5576 = vst [vmem:[#allocation14_spill] sm:$0xff] %v4743_v0  ;;  %v4746_v56 = vadd.f32 %v740_v25, %v4498_v44 }
 0x158   :  { %v4750_v61 = vpop.f32.mrf.mxu0 }
 0x159   :  { %5577 = vst [vmem:[#allocation15_spill] sm:$0xff] %v4746_v56  ;;  %5578 = vst [vmem:[#allocation16_spill] sm:$0xff] %v4750_v61 }
 0x15a   :  { %v746_v35 = vpop.f32.mrf.mxu0 }
 0x15b   :  { %v4753_v1 = vadd.f32 %v746_v35, %v4505_v22  ;;  %v4768_v22 = vpop.f32.mrf.mxu1 }
 0x15c   :  { %v748_v40 = vpop.f32.mrf.mxu0 }
 0x15d   :  { %5579 = vst [vmem:[#allocation17_spill] sm:$0xff] %v4753_v1  ;;  %v4761_v26 = vadd.f32 %v748_v40, %v4508_v55  ;;  %v4775_v0 = vpop.f32.mrf.mxu1 }
 0x15e   :  { %v750_v44 = vpop.f32.mrf.mxu0 }
 0x15f   :  { %v4766_v25 = vadd.f32 %v750_v44, %v4513_v48  ;;  %v512_v48 = vadd.f32 %v4532_v11, %v4530_v9  ;;  %v4785_v59 = vpop.f32.mrf.mxu1 }
 0x160   :  { %v752_v35 = vpop.f32.mrf.mxu0 }
 0x161   :  { %v4770_v1 = vadd.f32 %v752_v35, %v502_v18  ;;  %v4792_v35 = vpop.f32.mrf.mxu1 }
 0x162   :  { %v756_v56 = vpop.f32.mrf.mxu0 }
 0x163   :  { %v4773_v61 = vadd.f32 %v756_v56, %v4523_v63  ;;  %v4802_v11 = vpop.f32.mrf.mxu1 }
 0x164   :  { %v758_v55 = vpop.f32.mrf.mxu0 }
 0x165   :  { %v4778_v10 = vadd.f32 %v758_v55, %v4526_v3 }
 0x166   :  { %v760_v40 = vpop.f32.mrf.mxu0 }
 0x167   :  { %5580 = vst [vmem:[#allocation18_spill] sm:$0xff] %v4778_v10  ;;  %v4783_v58 = vadd.f32 %v760_v40, %v4528_v8  ;;  %v522_v8 = vadd.f32 %v4550_v36, %v4548_v34 }
 0x168   :  { %v762_v44 = vpop.f32.mrf.mxu0 }
 0x169   :  { %v4787_v18 = vadd.f32 %v762_v44, %v512_v48 }
 0x16a   :  { %v766_v63 = vpop.f32.mrf.mxu0 }
 0x16b   :  { %v4790_v56 = vadd.f32 %v766_v63, %v4541_v17  ;;  %v4809_v63 = vpop.f32.mrf.mxu1 }
 0x16c   :  { %v768_v3 = vpop.f32.mrf.mxu0 }
 0x16d   :  { %v4795_v55 = vadd.f32 %v768_v3, %v4544_v24  ;;  %v4819_v36 = vpop.f32.mrf.mxu1 }
 0x16e   :  { %v770_v10 = vpop.f32.mrf.mxu0 }
 0x16f   :  { %5581 = vst [vmem:[#allocation19_spill] sm:$0xff] %v4795_v55  ;;  %v4800_v9 = vadd.f32 %v770_v10, %v4546_v29  ;;  %v532_v29 = vadd.f32 %v4568_v49, %v4566_v39 }
 0x170   :  { %v772_v40 = vpop.f32.mrf.mxu0 }
 0x171   :  { %v4804_v48 = vadd.f32 %v772_v40, %v522_v8 }
 0x172   :  { %v776_v17 = vpop.f32.mrf.mxu0 }
 0x173   :  { %v4807_v44 = vadd.f32 %v776_v17, %v4553_v38  ;;  %v4826_v17 = vpop.f32.mrf.mxu1 }
 0x174   :  { %v778_v24 = vpop.f32.mrf.mxu0 }
 0x175   :  { %v4812_v3 = vadd.f32 %v778_v24, %v4556_v50  ;;  %v4836_v49 = vpop.f32.mrf.mxu1 }
 0x176   :  { %v780_v55 = vpop.f32.mrf.mxu0 }
 0x177   :  { %5582 = vst [vmem:[#allocation20_spill] sm:$0xff] %v4812_v3  ;;  %v4817_v34 = vadd.f32 %v780_v55, %v4564_v57  ;;  %v542_v57 = vadd.f32 %v4580_v16, %v4578_v14 }
 0x178   :  { %v782_v10 = vpop.f32.mrf.mxu0 }
 0x179   :  { %v4821_v8 = vadd.f32 %v782_v10, %v532_v29 }
 0x17a   :  { %v786_v38 = vpop.f32.mrf.mxu0 }
 0x17b   :  { %v4824_v40 = vadd.f32 %v786_v38, %v4571_v60  ;;  %v4843_v38 = vpop.f32.mrf.mxu1 }
 0x17c   :  { %v788_v50 = vpop.f32.mrf.mxu0 }
 0x17d   :  { %v4829_v24 = vadd.f32 %v788_v50, %v4574_v4 }
 0x17e   :  { %v790_v3 = vpop.f32.mrf.mxu0 }
 0x17f   :  { %5583 = vst [vmem:[#allocation21_spill] sm:$0xff] %v4829_v24  ;;  %v4834_v39 = vadd.f32 %v790_v3, %v4576_v13  ;;  %v4851_v13 = vpop.f32.mrf.mxu1 }
 0x180   :  { %v792_v55 = vpop.f32.mrf.mxu0 }
 0x181   :  { %v4838_v29 = vadd.f32 %v792_v55, %v542_v57 }
 0x182   :  { %v796_v60 = vpop.f32.mrf.mxu0 }
 0x183   :  { %v4841_v10 = vadd.f32 %v796_v60, %v4589_v28  ;;  %v4858_v28 = vpop.f32.mrf.mxu1 }
 0x184   :  { %v798_v4 = vpop.f32.mrf.mxu0 }
 0x185   :  { %5584 = vst [vmem:[#allocation22_spill] sm:$0xff] %v4841_v10  ;;  %v4846_v50 = vadd.f32 %v798_v4, %v4592_v41 }
 0x186   :  { %v800_v24 = vpop.f32.mrf.mxu0 }
 0x187   :  { %5585 = vst [vmem:[#allocation23_spill] sm:$0xff] %v4846_v50  ;;  %v4849_v14 = vadd.f32 %v800_v24, %v4594_v52  ;;  %v4866_v52 = vpop.f32.mrf.mxu1 }
 0x188   :  { %v4853_v16 = vpop.f32.mrf.mxu0 }
 0x189   :  { %5586 = vst [vmem:[#allocation24_spill] sm:$0xff] %v4849_v14  ;;  %5587 = vst [vmem:[#allocation25_spill] sm:$0xff] %v4853_v16 }
 0x18a   :  { %v806_v3 = vpop.f32.mrf.mxu0 }
 0x18b   :  { %v4856_v57 = vadd.f32 %v806_v3, %v4601_v62  ;;  %v4873_v62 = vpop.f32.mrf.mxu1 }
 0x18c   :  { %v808_v55 = vpop.f32.mrf.mxu0 }
 0x18d   :  { %5588 = vst [vmem:[#allocation26_spill] sm:$0xff] %v4856_v57  ;;  %v4861_v60 = vadd.f32 %v808_v55, %v4604_v5 }
 0x18e   :  { %v810_v41 = vpop.f32.mrf.mxu0 }
 0x18f   :  { %5589 = vst [vmem:[#allocation27_spill] sm:$0xff] %v4861_v60  ;;  %v4864_v4 = vadd.f32 %v810_v41, %v4606_v21  ;;  %v1483_v21 = vlaneseq  ;;  %v4881_v41 = vpop.f32.mrf.mxu1 }
 0x190   :  { %v4868_v24 = vpop.f32.mrf.mxu0 }
 0x191   :  { %5590 = vst [vmem:[#allocation28_spill] sm:$0xff] %v4864_v4  ;;  %5591 = vst [vmem:[#allocation29_spill] sm:$0xff] %v4868_v24 }
 0x192   :  { %v816_v14 = vpop.f32.mrf.mxu0 }
 0x193   :  { %v4871_v16 = vadd.f32 %v816_v14, %v4622_v27  ;;  %v4888_v27 = vshrl.u32 %v1483_v21, 7  ;;  %v4890_v14 = vpop.f32.mrf.mxu1 }
 0x194   :  { %v818_v3 = vpop.f32.mrf.mxu0 }
 0x195   :  { %5592 = vst [vmem:[#allocation30_spill] sm:$0xff] %v4871_v16  ;;  %v4876_v57 = vadd.f32 %v818_v3, %v4631_v31  ;;  %5597 = vst [vmem:[#allocation35_spill] sm:$0xff] %v4888_v27 }
 0x196   :  { %v820_v5 = vpop.f32.mrf.mxu0 }
 0x197   :  { %5593 = vst [vmem:[#allocation31_spill] sm:$0xff] %v4876_v57  ;;  %v4879_v55 = vadd.f32 %v820_v5, %v4634_v37  ;;  %v5559_v5 = vsub.s32 0, %v4888_v27  ;;  %v5602_v57 = vld [vmem:[#allocation12_spill] sm:$0xff] }
 0x198   :  { %v4883_v4 = vpop.f32.mrf.mxu0  ;;  %v1140_v50 = vadd.f32 %v4748_v45, %v5602_v57  ;;  %v1142_v45 = vadd.f32 %v4768_v22, %v4738_v53  ;;  %v5607_v22 = vld [vmem:[#allocation15_spill] sm:$0xff] }
 0x199   :  { %5594 = vst [vmem:[#allocation32_spill] sm:$0xff] %v4879_v55  ;;  %5595 = vst [vmem:[#allocation33_spill] sm:$0xff] %v4883_v4  ;;  %v4899_v55 = vpop.f32.mrf.mxu1 }
 0x19a   :  { %v826_v24 = vpop.f32.mrf.mxu0 }
 0x19b   :  { %v4886_v60 = vadd.f32 %v826_v24, %v4652_v7  ;;  %v1481_v7 = vld [vmem:[%s5550_s2] sm:$0x3]  ;;  %v472_v24 = vadd.f32 %v4478_v20, %v4476_v19 }
 0x19c   :  { %v828_v16 = vpop.f32.mrf.mxu0 }
 0x19d   :  { %5596 = vst [vmem:[#allocation34_spill] sm:$0xff] %v4886_v60  ;;  %v4893_v31 = vadd.f32 %v828_v16, %v4667_v6  ;;  %v5560_v6 = vsub.s32 1, %v4888_v27  ;;  %v838_v21 = vadd.f32 %v4703_v46, %v472_v24  ;;  %v482_v24 = vadd.f32 %v4490_v33, %v4488_v32 }
 0x19e   :  { %v830_v3 = vpop.f32.mrf.mxu0 }
 0x19f   :  { %5598 = vst [vmem:[#allocation36_spill] sm:$0xff] %v4893_v31  ;;  %v4896_v37 = vadd.f32 %v830_v3, %v4669_v2  ;;  %v4913_v3 = vrot.slane %v1481_v7, %v5559_v5  ;;  %v4920_v60 = vrot.slane %v1481_v7, %v5560_v6  ;;  %v1137_v20 = vadd.f32 %v4716_v54, %v838_v21  ;;  %v5601_v21 = vld [vmem:[#allocation13_spill] sm:$0xff] }
 0x1a0   :  { %v4901_v4 = vpop.f32.mrf.mxu0  ;;  %v1139_v54 = vadd.f32 %v4740_v30, %v4722_v47 }
 0x1a1   :  { %5599 = vst [vmem:[#allocation37_spill] sm:$0xff] %v4896_v37  ;;  %5600 = vst [vmem:[#allocation38_spill] sm:$0xff] %v4901_v4  ;;  %v4915_v37 = vpop.f32.mrf.mxu1 }
 0x1a2   :  { %v1314_v16 = vpop.f32.mrf.mxu0 }
 0x1a3   :  { %v1433_v2 = vadd.f32 %v1314_v16, %v4695_v23  ;;  %v4927_v16 = vpop.f32.mrf.mxu1 }
 0x1a4   :  { %v1316_v4 = vpop.f32.mrf.mxu0 }
 0x1a5   :  { %v1434_v31 = vadd.f32 %v1316_v4, %v4698_v42  ;;  %v1493_v46 = vadd.f32 %v4913_v3, %v1433_v2  ;;  %v1138_v42 = vadd.f32 %v4730_v12, %v4711_v51  ;;  %v842_v2 = vadd.f32 %v5601_v21, %v482_v24  ;;  %v4939_v51 = vpop.f32.mrf.mxu1 }
 0x1a6   :  { %v1318_v19 = vpop.f32.mrf.mxu0 }
 0x1a7   :  { %v1435_v23 = vadd.f32 %v1318_v19, %v4708_v43  ;;  %v1494_v4 = vadd.f32 %v4920_v60, %v1434_v31  ;;  %v1541_v19 = vmax.f32 %v1493_v46, 0.0  ;;  %v1141_v47 = vadd.f32 %v4758_v15, %v842_v2  ;;  %v4947_v57 = vpop.f32.mrf.mxu1  ;;  %v5605_v15 = vld [vmem:[#allocation14_spill] sm:$0xff] }
 0x1a8   :  { %v1320_v5 = vpop.f32.mrf.mxu0  ;;  %v1143_v2 = vadd.f32 %v4775_v0, %v5605_v15 }
 0x1a9   :  { %v1495_v7 = vadd.f32 %v4913_v3, %v1435_v23  ;;  %v1436_v6 = vadd.f32 %v1320_v5, %v1137_v20  ;;  %v1542_v31 = vmax.f32 %v1494_v4, 0.0 }
 0x1aa   :  { %v1324_v43 = vpop.f32.mrf.mxu0 }
 0x1ab   :  { %v1543_v27 = vmax.f32 %v1495_v7, 0.0  ;;  %v1496_v32 = vadd.f32 %v4920_v60, %v1436_v6  ;;  %v1437_v33 = vadd.f32 %v1324_v43, %v1138_v42  ;;  %v5603_v7 = vld [vmem:[#allocation2_spill] sm:$0xff]  ;;  %v5604_v6 = vld [vmem:[#allocation3_spill] sm:$0xff] }
 0x1ac   :  { %v1326_v12 = vpop.f32.mrf.mxu0  ;;  %v492_v42 = vadd.f32 %v5604_v6, %v5603_v7 }
 0x1ad   :  { %v1589_v23 = vmax.f32 %v1541_v19, %v1543_v27  ;;  %v1544_v5 = vmax.f32 %v1496_v32, 0.0  ;;  %v1438_v20 = vadd.f32 %v1326_v12, %v1139_v54  ;;  %v1497_v46 = vadd.f32 %v4913_v3, %v1437_v33  ;;  %v5606_v19 = vld [vmem:[#allocation16_spill] sm:$0xff] }
 0x1ae   :  { %v1328_v10 = vpop.f32.mrf.mxu0 }
 0x1af   :  { %v1590_v30 = vmax.f32 %v1542_v31, %v1544_v5  ;;  %v1439_v24 = vadd.f32 %v1328_v10, %v1140_v50  ;;  %v1498_v27 = vadd.f32 %v4920_v60, %v1438_v20  ;;  %v846_v10 = vadd.f32 %v5606_v19, %v492_v42 }
 0x1b0   :  { %v1330_v21 = vpop.f32.mrf.mxu0  ;;  %v1545_v32 = vmax.f32 %v1497_v46, 0.0  ;;  %v1144_v31 = vadd.f32 %v4785_v59, %v5607_v22 }
 0x1b1   :  { %v1613_v4 = vmax.f32 %v1589_v23, %v1590_v30  ;;  %v1499_v54 = vadd.f32 %v4913_v3, %v1439_v24  ;;  %v1440_v43 = vadd.f32 %v1330_v21, %v1141_v47  ;;  %v4957_v23 = vpop.f32.mrf.mxu1  ;;  %v1546_v20 = vmax.f32 %v1498_v27, 0.0  ;;  %v5608_v21 = vld [vmem:[#allocation17_spill] sm:$0xff] }
 0x1b2   :  { %v1334_v50 = vpop.f32.mrf.mxu0  ;;  %v1145_v6 = vadd.f32 %v4792_v35, %v846_v10 }
 0x1b3   :  { %v1547_v33 = vmax.f32 %v1499_v54, 0.0  ;;  %v1500_v12 = vadd.f32 %v4920_v60, %v1440_v43  ;;  %v1441_v53 = vadd.f32 %v1334_v50, %v1142_v45  ;;  %v1146_v45 = vadd.f32 %v4802_v11, %v5608_v21  ;;  %v4963_v54 = vpop.f32.mrf.mxu1  ;;  %v5609_v21 = vld [vmem:[#allocation18_spill] sm:$0xff] }
 0x1b4   :  { %v1336_v5 = vpop.f32.mrf.mxu0 }
 0x1b5   :  { %v1591_v30 = vmax.f32 %v1545_v32, %v1547_v33  ;;  %v1548_v47 = vmax.f32 %v1500_v12, 0.0  ;;  %v1442_v24 = vadd.f32 %v1336_v5, %v1143_v2  ;;  %v1501_v0 = vadd.f32 %v4913_v3, %v1441_v53  ;;  %v4974_v53 = vpop.f32.mrf.mxu1 }
 0x1b6   :  { %v1338_v7 = vpop.f32.mrf.mxu0  ;;  %v1147_v2 = vadd.f32 %v4809_v63, %v4761_v26  ;;  %v1148_v12 = vadd.f32 %v4819_v36, %v4766_v25 }
 0x1b7   :  { %v1592_v46 = vmax.f32 %v1546_v20, %v1548_v47  ;;  %v1443_v42 = vadd.f32 %v1338_v7, %v1144_v31  ;;  %v1502_v15 = vadd.f32 %v4920_v60, %v1442_v24  ;;  %v1549_v50 = vmax.f32 %v1501_v0, 0.0  ;;  %v4981_v7 = vpop.f32.mrf.mxu1 }
 0x1b8   :  { %v1340_v59 = vpop.f32.mrf.mxu0  ;;  %v1150_v0 = vadd.f32 %v4836_v49, %v4773_v61 }
 0x1b9   :  { %v1614_v43 = vmax.f32 %v1591_v30, %v1592_v46  ;;  %v1503_v27 = vadd.f32 %v4913_v3, %v1443_v42  ;;  %v1444_v19 = vadd.f32 %v1340_v59, %v1145_v6  ;;  %v1550_v31 = vmax.f32 %v1502_v15, 0.0 }
 0x1ba   :  { %v1344_v32 = vpop.f32.mrf.mxu0 }
 0x1bb   :  { %v4969_v35 = vpack.c.bf16 %v1614_v43, %v1613_v4  ;;  %v1551_v10 = vmax.f32 %v1503_v27, 0.0  ;;  %v1504_v33 = vadd.f32 %v4920_v60, %v1444_v19  ;;  %v1445_v11 = vadd.f32 %v1344_v32, %v1146_v45  ;;  %v3839_v19 = vld [vmem:[%s5549_s3 + $0x64] ss:$8 sps:$4 sm:$0xff]  }
 0x1bc   :  { %v1346_v22 = vpop.f32.mrf.mxu0  ;;  %v1149_v4 = vadd.f32 %v4826_v17, %v4770_v1  ;;  %v1151_v45 = vadd.f32 %v4843_v38, %v5609_v21  ;;  %v3834_v1 = vld [vmem:[%s5549_s3 + $0x70] ss:$8 sps:$4 sm:$0xff]   ;;  %v3845_v21 = vld [vmem:[%s5549_s3 + $0x44] ss:$8 sps:$4 sm:$0xff]  }
 0x1bd   :  { %v1593_v5 = vmax.f32 %v1549_v50, %v1551_v10  ;;  %v1552_v20 = vmax.f32 %v1504_v33, 0.0  ;;  %v1446_v30 = vadd.f32 %v1346_v22, %v1147_v2  ;;  %v1505_v26 = vadd.f32 %v4913_v3, %v1445_v11  ;;  %v4996_v50 = vpop.f32.mrf.mxu1 }
 0x1be   :  { %v1348_v63 = vpop.f32.mrf.mxu0  ;;  %v1152_v2 = vadd.f32 %v4851_v13, %v4783_v58  ;;  %v5610_v22 = vmov 0   ;;  %v1153_v58 = vadd.f32 %v4858_v28, %v4787_v18  ;;  %v5611_v18 = vld [vmem:[#allocation19_spill] sm:$0xff] }
 0x1bf   :  { %v1594_v47 = vmax.f32 %v1550_v31, %v1552_v20  ;;  %v1447_v24 = vadd.f32 %v1348_v63, %v1148_v12  ;;  %v1506_v6 = vadd.f32 %v4920_v60, %v1446_v30  ;;  %v1553_v59 = vmax.f32 %v1505_v26, 0.0  ;;  %v3837_v31 = vld [vmem:[%s5549_s3 + $0x60] ss:$8 sps:$4 sm:$0xff]   ;;  %v3842_v20 = vld [vmem:[%s5549_s3 + $0x54] ss:$8 sps:$4 sm:$0xff]   ;;  %v5010_v26 = vpop.f32.mrf.mxu1 }
 0x1c0   :  { %v1350_v25 = vpop.f32.mrf.mxu0  ;;  %v1154_v30 = vadd.f32 %v4866_v52, %v4790_v56  ;;  %v1155_v28 = vadd.f32 %v4873_v62, %v5611_v18  ;;  %v1156_v62 = vadd.f32 %v4881_v41, %v4800_v9  ;;  %v3848_v41 = vld [vmem:[%s5549_s3 + $0x34] ss:$8 sps:$4 sm:$0xff]  }
 0x1c1   :  { %v1615_v36 = vmax.f32 %v1593_v5, %v1594_v47  ;;  %v1507_v46 = vadd.f32 %v4913_v3, %v1447_v24  ;;  %v1448_v42 = vadd.f32 %v1350_v25, %v1149_v4  ;;  %v1554_v32 = vmax.f32 %v1506_v6, 0.0 }
 0x1c2   :  { %v1354_v15 = vpop.f32.mrf.mxu0 }
 0x1c3   :  { %v1645_v17 = vpack.c.bf16 %v1615_v36, %v1614_v43  ;;  %v1555_v61 = vmax.f32 %v1507_v46, 0.0  ;;  %v1508_v49 = vadd.f32 %v4920_v60, %v1448_v42  ;;  %v1449_v27 = vadd.f32 %v1354_v15, %v1150_v0  ;;  %v3840_v46 = vld [vmem:[%s5549_s3 + $0x50] ss:$8 sps:$4 sm:$0xff]  }
 0x1c4   :  { %v1356_v38 = vpop.f32.mrf.mxu0 }
 0x1c5   :  { %v1595_v10 = vmax.f32 %v1553_v59, %v1555_v61  ;;  %v1556_v33 = vmax.f32 %v1508_v49, 0.0  ;;  %v1450_v11 = vadd.f32 %v1356_v38, %v1151_v45  ;;  %1779 = vmatmul.mubr.bf16.vlgmr.msra.gmra.mxu1 %v1645_v17  ;;  %v1509_v43 = vadd.f32 %v4913_v3, %v1449_v27  ;;  %v5027_v59 = vpop.f32.mrf.mxu1 }
 0x1c6   :  { %v1358_v12 = vpop.f32.mrf.mxu0  ;;  %1788 = vmatprep.mubr.bf16.mxu1 %v5610_v22  ;;  %1900 = vmatpush1.bf16.msra.mxu1 %v3834_v1 }
 0x1c7   :  { %v1596_v13 = vmax.f32 %v1554_v32, %v1556_v33  ;;  %v1451_v5 = vadd.f32 %v1358_v12, %v1152_v2  ;;  %1901 = vmatprep.subr.bf16.mxu1 %v3839_v19  ;;  %v1510_v4 = vadd.f32 %v4920_v60, %v1450_v11  ;;  %v1557_v25 = vmax.f32 %v1509_v43, 0.0  ;;  %v3843_v2 = vld [vmem:[%s5549_s3 + $0x40] ss:$8 sps:$4 sm:$0xff]  }
 0x1c8   :  { %v1360_v63 = vpop.f32.mrf.mxu0  ;;  %v1158_v32 = vadd.f32 %v4899_v55, %v4807_v44  ;;  %v3846_v55 = vld [vmem:[%s5549_s3 + $0x30] ss:$8 sps:$4 sm:$0xff]  }
 0x1c9   :  { %v1511_v47 = vadd.f32 %v4913_v3, %v1451_v5  ;;  %v1452_v24 = vadd.f32 %v1360_v63, %v1153_v58  ;;  %v1616_v0 = vmax.f32 %v1595_v10, %v1596_v13  ;;  %v1558_v1 = vmax.f32 %v1510_v4, 0.0  ;;  %v5040_v10 = vpop.f32.mrf.mxu1 }
 0x1ca   :  { %v1364_v6 = vpop.f32.mrf.mxu0  ;;  %1902 = vmatpush1.bf16.msra.mxu1 %v3837_v31  ;;  %v1160_v63 = vadd.f32 %v4927_v16, %v4817_v34  ;;  %v1161_v34 = vadd.f32 %v4939_v51, %v4821_v8 }
 0x1cb   :  { %v1559_v56 = vmax.f32 %v1511_v47, 0.0  ;;  %v1512_v52 = vadd.f32 %v4920_v60, %v1452_v24  ;;  %v1453_v42 = vadd.f32 %v1364_v6, %v1154_v30  ;;  %1903 = vmatprep.subr.bf16.mxu1 %v3842_v20  ;;  %v5023_v45 = vpack.c.bf16 %v1616_v0, %v1615_v36  ;;  %v5052_v4 = vpop.f32.mrf.mxu1 }
 0x1cc   :  { %v1366_v15 = vpop.f32.mrf.mxu0  ;;  %v1157_v36 = vadd.f32 %v4890_v14, %v4804_v48  ;;  %v5612_v48 = vld [vmem:[#allocation20_spill] sm:$0xff] }
 0x1cd   :  { %v1597_v17 = vmax.f32 %v1557_v25, %v1559_v56  ;;  %v1560_v61 = vmax.f32 %v1512_v52, 0.0  ;;  %v1454_v49 = vadd.f32 %v1366_v15, %v1155_v28  ;;  %v1513_v27 = vadd.f32 %v4913_v3, %v1453_v42  ;;  %v3849_v56 = vld [vmem:[%s5549_s3 + $0x20] ss:$8 sps:$4 sm:$0xff]   ;;  %v5067_v42 = vpop.f32.mrf.mxu1 }
 0x1ce   :  { %v1368_v19 = vpop.f32.mrf.mxu0  ;;  %1904 = vmatpush1.bf16.msra.mxu1 %v3840_v46  ;;  %v1159_v14 = vadd.f32 %v4915_v37, %v5612_v48  ;;  %v3851_v37 = vld [vmem:[%s5549_s3 + $0x24] ss:$8 sps:$4 sm:$0xff]   ;;  %v1162_v52 = vadd.f32 %v4947_v57, %v4824_v40 }
 0x1cf   :  { %v1598_v38 = vmax.f32 %v1558_v1, %v1560_v61  ;;  %v1455_v9 = vadd.f32 %v1368_v19, %v1156_v62  ;;  %1905 = vmatprep.subr.bf16.mxu1 %v3845_v21  ;;  %v1514_v11 = vadd.f32 %v4920_v60, %v1454_v49  ;;  %v1561_v58 = vmax.f32 %v1513_v27, 0.0  ;;  %v3854_v62 = vld [vmem:[%s5549_s3 + $0x14] ss:$8 sps:$4 sm:$0xff]  }
 0x1d0   :  { %v1370_v33 = vpop.f32.mrf.mxu0 }
 0x1d1   :  { %v1515_v43 = vadd.f32 %v4913_v3, %v1455_v9  ;;  %v1456_v12 = vadd.f32 %v1370_v33, %v1157_v36  ;;  %v1617_v31 = vmax.f32 %v1597_v17, %v1598_v38  ;;  %v1562_v24 = vmax.f32 %v1514_v11, 0.0  ;;  %v5613_v17 = vld [vmem:[#allocation21_spill] sm:$0xff]  ;;  %v5084_v9 = vpop.f32.mrf.mxu1 }
 0x1d2   :  { %v1374_v13 = vpop.f32.mrf.mxu0  ;;  %1906 = vmatpush1.bf16.msra.mxu1 %v3843_v2  ;;  %v1163_v61 = vadd.f32 %v4957_v23, %v5613_v17  ;;  %v3852_v2 = vld [vmem:[%s5549_s3 + $0x10] ss:$8 sps:$4 sm:$0xff]   ;;  %v1164_v38 = vadd.f32 %v4963_v54, %v4834_v39  ;;  %v3857_v23 = vld [vmem:[%s5549_s3 + $0x4] ss:$8 sps:$4 sm:$0xff]   ;;  %v3855_v54 = vld [vmem:[%s5549_s3] ss:$8 sps:$4 sm:$0xff]  }
 0x1d3   :  { %v1563_v5 = vmax.f32 %v1515_v43, 0.0  ;;  %v1516_v20 = vadd.f32 %v4920_v60, %v1456_v12  ;;  %v1457_v30 = vadd.f32 %v1374_v13, %v1158_v32  ;;  %v1646_v44 = vpack.c.bf16 %v1617_v31, %v1616_v0  ;;  %1907 = vmatprep.subr.bf16.mxu1 %v3848_v41  ;;  %v5615_v13 = vld [vmem:[#allocation5_spill] sm:$0xff] }
 0x1d4   :  { %v1376_v47 = vpop.f32.mrf.mxu0 }
 0x1d5   :  { %v1599_v18 = vmax.f32 %v1561_v58, %v1563_v5  ;;  %v1564_v28 = vmax.f32 %v1516_v20, 0.0  ;;  %v1458_v25 = vadd.f32 %v1376_v47, %v1159_v14  ;;  %1789 = vmatmul.mubr.bf16.gmra.mxu1 %v1646_v44  ;;  %2290 = vmatmul.mubr.bf16.vlgmr.msra.gmra.mxu0 %v1646_v44  ;;  %v1517_v0 = vadd.f32 %v4913_v3, %v1457_v30  ;;  %v5614_v58 = vld [vmem:[#allocation4_spill] sm:$0xff]  ;;  %v5616_v20 = vld [vmem:[#allocation22_spill] sm:$0xff]  ;;  %v5099_v44 = vpop.f32.mrf.mxu1 }
 0x1d6   :  { %v1378_v6 = vpop.f32.mrf.mxu0  ;;  %1798 = vmatprep.mubr.bf16.mxu1 %v5610_v22  ;;  %2299 = vmatprep.mubr.bf16.mxu0 %v5610_v22  ;;  %v552_v5 = vadd.f32 %v5615_v13, %v5614_v58  ;;  %v1166_v30 = vadd.f32 %v4981_v7, %v5616_v20  ;;  %v5625_v13 = vld [vmem:[#allocation28_spill] sm:$0xff] }
 0x1d7   :  { %v1600_v16 = vmax.f32 %v1562_v24, %v1564_v28  ;;  %v1459_v46 = vadd.f32 %v1378_v6, %v1160_v63  ;;  %1908 = vmatpush1.bf16.msra.mxu1 %v3846_v55  ;;  %v1518_v8 = vadd.f32 %v4920_v60, %v1458_v25  ;;  %v1565_v49 = vmax.f32 %v1517_v0, 0.0  ;;  %v5617_v24 = vld [vmem:[#allocation23_spill] sm:$0xff]  ;;  %v5618_v28 = vld [vmem:[#allocation25_spill] sm:$0xff] }
 0x1d8   :  { %v1380_v21 = vpop.f32.mrf.mxu0  ;;  %1909 = vmatprep.subr.bf16.mxu1 %v3851_v37  ;;  %v870_v25 = vadd.f32 %v5618_v28, %v552_v5  ;;  %v1172_v5 = vadd.f32 %v5067_v42, %v5625_v13 }
 0x1d9   :  { %v1519_v51 = vadd.f32 %v4913_v3, %v1459_v46  ;;  %v1460_v15 = vadd.f32 %v1380_v21, %v1161_v34  ;;  %v1618_v1 = vmax.f32 %v1599_v18, %v1600_v16  ;;  %v1566_v32 = vmax.f32 %v1518_v8, 0.0  ;;  %v1117_v21 = vpop.f32.mrf.mxu1 }
 0x1da   :  { %v1384_v27 = vpop.f32.mrf.mxu0  ;;  %v1167_v18 = vadd.f32 %v4996_v50, %v5617_v24 }
 0x1db   :  { %v1567_v40 = vmax.f32 %v1519_v51, 0.0  ;;  %v1520_v57 = vadd.f32 %v4920_v60, %v1460_v15  ;;  %v1461_v19 = vadd.f32 %v1384_v27, %v1162_v52  ;;  %1910 = vmatpush1.bf16.msra.mxu1 %v3849_v56  ;;  %v5080_v36 = vpack.c.bf16 %v1618_v1, %v1617_v31  ;;  %v5619_v56 = vld [vmem:[#allocation24_spill] sm:$0xff]  ;;  %v5620_v27 = vld [vmem:[#allocation6_spill] sm:$0xff] }
 0x1dc   :  { %v1386_v41 = vpop.f32.mrf.mxu0  ;;  %1911 = vmatprep.subr.bf16.mxu1 %v3854_v62  ;;  %v1165_v31 = vadd.f32 %v4974_v53, %v4838_v29  ;;  %v3860_v29 = vld [vmem:[%s5549_s3 + $0x174] ss:$8 sps:$4 sm:$0xff]   ;;  %v1168_v52 = vadd.f32 %v5010_v26, %v5619_v56 }
 0x1dd   :  { %v1601_v33 = vmax.f32 %v1565_v49, %v1567_v40  ;;  %v1568_v11 = vmax.f32 %v1520_v57, 0.0  ;;  %v1462_v43 = vadd.f32 %v1386_v41, %v1163_v61  ;;  %v1521_v12 = vadd.f32 %v4913_v3, %v1461_v19  ;;  %v5621_v40 = vld [vmem:[#allocation7_spill] sm:$0xff]  ;;  %v5622_v19 = vld [vmem:[#allocation26_spill] sm:$0xff] }
 0x1de   :  { %v1388_v48 = vpop.f32.mrf.mxu0  ;;  %v562_v57 = vadd.f32 %v5621_v40, %v5620_v27 }
 0x1df   :  { %v1602_v14 = vmax.f32 %v1566_v32, %v1568_v11  ;;  %v1463_v39 = vadd.f32 %v1388_v48, %v1164_v38  ;;  %1912 = vmatpush1.bf16.msra.mxu1 %v3852_v2  ;;  %v1522_v53 = vadd.f32 %v4920_v60, %v1462_v43  ;;  %v1569_v7 = vmax.f32 %v1521_v12, 0.0  ;;  %v1119_v38 = vpop.f32.mrf.mxu1  ;;  %v5623_v43 = vld [vmem:[#allocation27_spill] sm:$0xff] }
 0x1e0   :  { %v1390_v55 = vpop.f32.mrf.mxu0  ;;  %1913 = vmatprep.subr.bf16.mxu1 %v3857_v23  ;;  %v1170_v2 = vadd.f32 %v5040_v10, %v5622_v19  ;;  %v1171_v12 = vadd.f32 %v5052_v4, %v5623_v43  ;;  %v5632_v43 = vld [vmem:[#allocation10_spill] sm:$0xff] }
 0x1e1   :  { %v1523_v63 = vadd.f32 %v4913_v3, %v1463_v39  ;;  %v1464_v47 = vadd.f32 %v1390_v55, %v1165_v31  ;;  %v1619_v37 = vmax.f32 %v1601_v33, %v1602_v14  ;;  %v1570_v8 = vmax.f32 %v1522_v53, 0.0  ;;  %v1121_v20 = vpop.f32.mrf.mxu1 }
 0x1e2   :  { %v1394_v0 = vpop.f32.mrf.mxu0 }
 0x1e3   :  { %v1571_v6 = vmax.f32 %v1523_v63, 0.0  ;;  %v1524_v34 = vadd.f32 %v4920_v60, %v1464_v47  ;;  %v1465_v16 = vadd.f32 %v1394_v0, %v1166_v30  ;;  %v1647_v46 = vpack.c.bf16 %v1619_v37, %v1618_v1  ;;  %1914 = vmatpush1.bf16.msra.mxu1 %v3855_v54  ;;  %v5628_v0 = vld [vmem:[#allocation30_spill] sm:$0xff]  ;;  %v1125_v42 = vpop.f32.mrf.mxu1 }
 0x1e4   :  { %v1396_v62 = vpop.f32.mrf.mxu0  ;;  %2070 = vmatprep.subr.bf16.mxu1 %v3860_v29  ;;  %v1169_v1 = vadd.f32 %v5027_v59, %v870_v25  ;;  %v5624_v59 = vld [vmem:[#allocation29_spill] sm:$0xff]  ;;  %v5626_v25 = vld [vmem:[#allocation8_spill] sm:$0xff] }
 0x1e5   :  { %v1603_v51 = vmax.f32 %v1569_v7, %v1571_v6  ;;  %v1572_v15 = vmax.f32 %v1524_v34, 0.0  ;;  %v1466_v50 = vadd.f32 %v1396_v62, %v1167_v18  ;;  %1799 = vmatmul.mubr.bf16.gmra.mxu1 %v1647_v46  ;;  %2300 = vmatmul.mubr.bf16.gmra.mxu0 %v1647_v46  ;;  %v1525_v17 = vadd.f32 %v4913_v3, %v1465_v16  ;;  %v5627_v7 = vld [vmem:[#allocation9_spill] sm:$0xff]  ;;  %v5629_v62 = vld [vmem:[#allocation31_spill] sm:$0xff]  ;;  %v1127_v27 = vpop.f32.mrf.mxu1 }
 0x1e6   :  { %v1398_v61 = vpop.f32.mrf.mxu0  ;;  %1808 = vmatprep.mubr.bf16.mxu1 %v5610_v22  ;;  %2309 = vmatprep.mubr.bf16.mxu0 %v5610_v22  ;;  %v874_v48 = vadd.f32 %v5624_v59, %v562_v57  ;;  %v1174_v6 = vadd.f32 %v5099_v44, %v5628_v0  ;;  %v5631_v44 = vld [vmem:[#allocation32_spill] sm:$0xff]  ;;  %v5634_v59 = vld [vmem:[#allocation34_spill] sm:$0xff] }
 0x1e7   :  { %v1604_v49 = vmax.f32 %v1570_v8, %v1572_v15  ;;  %v1467_v26 = vadd.f32 %v1398_v61, %v1168_v52  ;;  %v1526_v23 = vadd.f32 %v4920_v60, %v1466_v50  ;;  %v1573_v31 = vmax.f32 %v1525_v17, 0.0 }
 0x1e8   :  { %v1400_v41 = vpop.f32.mrf.mxu0  ;;  %v1173_v24 = vadd.f32 %v5084_v9, %v874_v48  ;;  %v1175_v8 = vadd.f32 %v1117_v21, %v5629_v62  ;;  %v1178_v48 = vadd.f32 %v1125_v42, %v5634_v59  ;;  %v3879_v59 = vld [vmem:[%s5549_s3 + $0x100] ss:$8 sps:$4 sm:$0xff]  }
 0x1e9   :  { %v1527_v32 = vadd.f32 %v4913_v3, %v1467_v26  ;;  %v1468_v33 = vadd.f32 %v1400_v41, %v1169_v1  ;;  %v1620_v11 = vmax.f32 %v1603_v51, %v1604_v49  ;;  %v1574_v55 = vmax.f32 %v1526_v23, 0.0  ;;  %v5630_v51 = vld [vmem:[#allocation33_spill] sm:$0xff] }
 0x1ea   :  { %v1404_v14 = vpop.f32.mrf.mxu0  ;;  %v1176_v26 = vadd.f32 %v1119_v38, %v5631_v44  ;;  %v5633_v38 = vld [vmem:[#allocation11_spill] sm:$0xff] }
 0x1eb   :  { %v1575_v39 = vmax.f32 %v1527_v32, 0.0  ;;  %v1528_v54 = vadd.f32 %v4920_v60, %v1468_v33  ;;  %v1469_v58 = vadd.f32 %v1404_v14, %v1170_v2  ;;  %v5126_v10 = vpack.c.bf16 %v1620_v11, %v1619_v37 }
 0x1ec   :  { %v1406_v30 = vpop.f32.mrf.mxu0  ;;  %v572_v37 = vadd.f32 %v5627_v7, %v5626_v25  ;;  %v5637_v25 = vld [vmem:[#allocation37_spill] sm:$0xff] }
 0x1ed   :  { %v1605_v29 = vmax.f32 %v1573_v31, %v1575_v39  ;;  %v1576_v53 = vmax.f32 %v1528_v54, 0.0  ;;  %v1470_v63 = vadd.f32 %v1406_v30, %v1171_v12  ;;  %v1529_v4 = vadd.f32 %v4913_v3, %v1469_v58  ;;  %v1129_v31 = vpop.f32.mrf.mxu1 }
 0x1ee   :  { %v1408_v47 = vpop.f32.mrf.mxu0  ;;  %v878_v9 = vadd.f32 %v5630_v51, %v572_v37  ;;  %v582_v12 = vadd.f32 %v5633_v38, %v5632_v43  ;;  %v1180_v7 = vadd.f32 %v1129_v31, %v5637_v25  ;;  %v3878_v43 = vld [vmem:[%s5549_s3 + $0x114] ss:$8 sps:$4 sm:$0xff]   ;;  %v3876_v38 = vld [vmem:[%s5549_s3 + $0x110] ss:$8 sps:$4 sm:$0xff]   ;;  %v3912_v25 = vld [vmem:[%s5551_s5 + $0x68] sm:$0xff]  }
 0x1ef   :  { %v1606_v18 = vmax.f32 %v1574_v55, %v1576_v53  ;;  %v1471_v28 = vadd.f32 %v1408_v47, %v1172_v5  ;;  %v1530_v16 = vadd.f32 %v4920_v60, %v1470_v63  ;;  %v1577_v15 = vmax.f32 %v1529_v4, 0.0  ;;  %v5635_v5 = vld [vmem:[#allocation36_spill] sm:$0xff]  ;;  %v5636_v55 = vld [vmem:[#allocation38_spill] sm:$0xff]  ;;  %v1131_v37 = vpop.f32.mrf.mxu1 }
 0x1f0   :  { %v1410_v34 = vpop.f32.mrf.mxu0  ;;  %v1177_v32 = vadd.f32 %v1121_v20, %v878_v9  ;;  %v1179_v30 = vadd.f32 %v1127_v27, %v5635_v5  ;;  %v3858_v63 = vld [vmem:[%s5549_s3 + $0x170] ss:$8 sps:$4 sm:$0xff]   ;;  %v3866_v9 = vld [vmem:[%s5549_s3 + $0x154] ss:$8 sps:$4 sm:$0xff]  }
 0x1f1   :  { %v1531_v46 = vadd.f32 %v4913_v3, %v1471_v28  ;;  %v1472_v56 = vadd.f32 %v1410_v34, %v1173_v24  ;;  %v1621_v52 = vmax.f32 %v1605_v29, %v1606_v18  ;;  %v1578_v57 = vmax.f32 %v1530_v16, 0.0  ;;  %v3863_v18 = vld [vmem:[%s5549_s3 + $0x164] ss:$8 sps:$4 sm:$0xff]   ;;  %v3882_v31 = vld [vmem:[%s5549_s3 + $0x270] ss:$8 sps:$4 sm:$0xff]  }
 0x1f2   :  { %v1414_v50 = vpop.f32.mrf.mxu0  ;;  %v882_v29 = vadd.f32 %v5636_v55, %v582_v12  ;;  %v3881_v12 = vld [vmem:[%s5549_s3 + $0x104] ss:$8 sps:$4 sm:$0xff]   ;;  %v3896_v5 = vld [vmem:[%s5549_s3 + $0x234] ss:$8 sps:$4 sm:$0xff]  }
 0x1f3   :  { %v1579_v17 = vmax.f32 %v1531_v46, 0.0  ;;  %v1532_v61 = vadd.f32 %v4920_v60, %v1472_v56  ;;  %v1473_v1 = vadd.f32 %v1414_v50, %v1174_v6  ;;  %v1648_v49 = vpack.c.bf16 %v1621_v52, %v1620_v11  ;;  %v3861_v56 = vld [vmem:[%s5549_s3 + $0x160] ss:$8 sps:$4 sm:$0xff]   ;;  %v3899_v55 = vld [vmem:[%s5549_s3 + $0x224] ss:$8 sps:$4 sm:$0xff]  }
 0x1f4   :  { %v1416_v40 = vpop.f32.mrf.mxu0 }
 0x1f5   :  { %v1607_v19 = vmax.f32 %v1577_v15, %v1579_v17  ;;  %v1580_v2 = vmax.f32 %v1532_v61, 0.0  ;;  %v1474_v41 = vadd.f32 %v1416_v40, %v1175_v8  ;;  %1809 = vmatmul.mubr.bf16.gmra.mxu1 %v1648_v49  ;;  %2310 = vmatmul.mubr.bf16.gmra.mxu0 %v1648_v49  ;;  %v1533_v21 = vadd.f32 %v4913_v3, %v1473_v1  ;;  %v3864_v1 = vld [vmem:[%s5549_s3 + $0x150] ss:$8 sps:$4 sm:$0xff]   ;;  %v3869_v40 = vld [vmem:[%s5549_s3 + $0x144] ss:$8 sps:$4 sm:$0xff]  }
 0x1f6   :  { %v1418_v23 = vpop.f32.mrf.mxu0  ;;  %1931 = vmatprep.mubr.bf16.mxu1 %v5610_v22  ;;  %2319 = vmatprep.mubr.bf16.mxu0 %v5610_v22 }
 0x1f7   :  { %v1608_v33 = vmax.f32 %v1578_v57, %v1580_v2  ;;  %v1475_v11 = vadd.f32 %v1418_v23, %v1176_v26  ;;  %v1534_v54 = vadd.f32 %v4920_v60, %v1474_v41  ;;  %v1581_v20 = vmax.f32 %v1533_v21, 0.0  ;;  %v3872_v41 = vld [vmem:[%s5549_s3 + $0x134] ss:$8 sps:$4 sm:$0xff]   ;;  %v3870_v23 = vld [vmem:[%s5549_s3 + $0x130] ss:$8 sps:$4 sm:$0xff]  }
 0x1f8   :  { %v1420_v14 = vpop.f32.mrf.mxu0 }
 0x1f9   :  { %v1622_v39 = vmax.f32 %v1607_v19, %v1608_v33  ;;  %v1535_v58 = vadd.f32 %v4913_v3, %v1475_v11  ;;  %v1476_v13 = vadd.f32 %v1420_v14, %v1177_v32  ;;  %v1582_v6 = vmax.f32 %v1534_v54, 0.0  ;;  %v3875_v32 = vld [vmem:[%s5549_s3 + $0x124] ss:$8 sps:$4 sm:$0xff]   ;;  %v3873_v11 = vld [vmem:[%s5549_s3 + $0x120] ss:$8 sps:$4 sm:$0xff]  }
 0x1fa   :  { %v1424_v53 = vpop.f32.mrf.mxu0  ;;  %v3887_v14 = vld [vmem:[%s5549_s3 + $0x264] ss:$8 sps:$4 sm:$0xff]   ;;  %v3890_v54 = vld [vmem:[%s5549_s3 + $0x254] ss:$8 sps:$4 sm:$0xff]  }
 0x1fb   :  { %v1583_v4 = vmax.f32 %v1535_v58, 0.0  ;;  %v1536_v47 = vadd.f32 %v4920_v60, %v1476_v13  ;;  %v1477_v24 = vadd.f32 %v1424_v53, %v1178_v48  ;;  %v5159_v28 = vpack.c.bf16 %v1622_v39, %v1621_v52  ;;  %v3884_v48 = vld [vmem:[%s5549_s3 + $0x274] ss:$8 sps:$4 sm:$0xff]   ;;  %v3888_v58 = vld [vmem:[%s5549_s3 + $0x250] ss:$8 sps:$4 sm:$0xff]  }
 0x1fc   :  { %v1426_v0 = vpop.f32.mrf.mxu0  ;;  %v1181_v52 = vadd.f32 %v1131_v37, %v882_v29  ;;  %v3891_v13 = vld [vmem:[%s5549_s3 + $0x240] ss:$8 sps:$4 sm:$0xff]   ;;  %v3900_v53 = vld [vmem:[%s5549_s3 + $0x210] ss:$8 sps:$4 sm:$0xff]  }
 0x1fd   :  { %v1609_v42 = vmax.f32 %v1581_v20, %v1583_v4  ;;  %v1584_v34 = vmax.f32 %v1536_v47, 0.0  ;;  %v1478_v16 = vadd.f32 %v1426_v0, %v1179_v30  ;;  %1932 = vmatmul.mubr.bf16.vlgmr.msra.gmra.mxu1 %v4969_v35  ;;  %v1537_v8 = vadd.f32 %v4913_v3, %v1477_v24  ;;  %v3894_v30 = vld [vmem:[%s5549_s3 + $0x230] ss:$8 sps:$4 sm:$0xff]   ;;  %v3897_v29 = vld [vmem:[%s5549_s3 + $0x220] ss:$8 sps:$4 sm:$0xff]  }
 0x1fe   :  { %v1428_v46 = vpop.f32.mrf.mxu0  ;;  %2071 = vmatpush1.bf16.msra.mxu1 %v3858_v63  ;;  %1941 = vmatprep.mubr.bf16.mxu1 %v5610_v22  ;;  %v3902_v20 = vld [vmem:[%s5549_s3 + $0x214] ss:$8 sps:$4 sm:$0xff]   ;;  %v3905_v63 = vld [vmem:[%s5549_s3 + $0x204] ss:$8 sps:$4 sm:$0xff]   ;;  %v3903_v4 = vld [vmem:[%s5549_s3 + $0x200] ss:$8 sps:$4 sm:$0xff]  }
 0x1ff   :  { %v1610_v62 = vmax.f32 %v1582_v6, %v1584_v34  ;;  %v1479_v51 = vadd.f32 %v1428_v46, %v1180_v7  ;;  %2072 = vmatprep.subr.bf16.mxu1 %v3863_v18  ;;  %v1538_v50 = vadd.f32 %v4920_v60, %v1478_v16  ;;  %v1585_v49 = vmax.f32 %v1537_v8, 0.0  ;;  %v3906_v47 = vld [vmem:[%s5551_s5 + $0x38] sm:$0xff]   ;;  %v3910_v18 = vld [vmem:[%s5551_s5 + $0x70] sm:$0xff]   ;;  %v3914_v37 = vld [vmem:[%s5551_s5 + $0x60] sm:$0xff]  }
 0x200   :  { %v1430_v15 = vpop.f32.mrf.mxu0  ;;  %v3947_v24 = vmov 0.0   ;;  %v3913_v7 = vld [vmem:[%s5551_s5 + $0x18] sm:$0xff]   ;;  %v3915_v0 = vld [vmem:[%s5551_s5 + $0x10] sm:$0xff]   ;;  %v3919_v16 = vld [vmem:[%s5551_s5] sm:$0xff]  }
 0x201   :  { %v1623_v35 = vmax.f32 %v1609_v42, %v1610_v62  ;;  %v1539_v17 = vadd.f32 %v4913_v3, %v1479_v51  ;;  %v1480_v61 = vadd.f32 %v1430_v15, %v1181_v52  ;;  %v1586_v57 = vmax.f32 %v1538_v50, 0.0  ;;  %v3867_v3 = vld [vmem:[%s5549_s3 + $0x140] ss:$8 sps:$4 sm:$0xff]   ;;  %3563 = vmatprep.subr.bf16.mxu0 %v3947_v24  ;;  %v3916_v6 = vld [vmem:[%s5551_s5 + $0x58] sm:$0xff]   ;;  %v3918_v34 = vld [vmem:[%s5551_s5 + $0x50] sm:$0xff]  }
 0x202   :  { %2073 = vmatpush1.bf16.msra.mxu1 %v3861_v56  ;;  %v3917_v42 = vld [vmem:[%s5551_s5 + $0x8] sm:$0xff]   ;;  %v3922_v8 = vld [vmem:[%s5551_s5 + $0x40] sm:$0xff]  }
 0x203   :  { %v1587_v44 = vmax.f32 %v1539_v17, 0.0  ;;  %v1540_v26 = vadd.f32 %v4920_v60, %v1480_v61  ;;  %2074 = vmatprep.subr.bf16.mxu1 %v3866_v9  ;;  %v2159_v27 = vpack.c.bf16 %v1623_v35, %v1622_v39  ;;  %v3885_v39 = vld [vmem:[%s5549_s3 + $0x260] ss:$8 sps:$4 sm:$0xff]  }
 0x204   :  { %v3920_v56 = vld [vmem:[%s5551_s5 + $0x48] sm:$0xff]  }
 0x205   :  { %v1611_v19 = vmax.f32 %v1585_v49, %v1587_v44  ;;  %v1588_v2 = vmax.f32 %v1540_v26, 0.0  ;;  %1942 = vmatmul.mubr.bf16.gmra.mxu1 %v5023_v45  ;;  %2320 = vmatmul.mubr.bf16.gmra.mxu0 %v2159_v27 }
 0x206   :  { %2075 = vmatpush1.bf16.msra.mxu1 %v3864_v1  ;;  %1951 = vmatprep.mubr.bf16.mxu1 %v5610_v22 }
 0x207   :  { %v1612_v60 = vmax.f32 %v1586_v57, %v1588_v2  ;;  %2076 = vmatprep.subr.bf16.mxu1 %v3869_v40  ;;  %3579 = vmatprep.mubr.msk.bf16.mxu0 %vm3948_vm0, %v3947_v24 }
 0x209   :  { %v1624_v21 = vmax.f32 %v1611_v19, %v1612_v60 }
 0x20a   :  { %2077 = vmatpush1.bf16.msra.mxu1 %v3867_v3 }
 0x20b   :  { %2078 = vmatprep.subr.bf16.mxu1 %v3872_v41  ;;  %v2346_v33 = vpack.c.bf16 %v1624_v21, %v1623_v35 }
 0x20d   :  { %1952 = vmatmul.mubr.bf16.gmra.mxu1 %v5080_v36 }
 0x20e   :  { %2079 = vmatpush1.bf16.msra.mxu1 %v3870_v23  ;;  %1961 = vmatprep.mubr.bf16.mxu1 %v5610_v22 }
 0x20f   :  { %2080 = vmatprep.subr.bf16.mxu1 %v3875_v32 }
 0x212   :  { %2081 = vmatpush1.bf16.msra.mxu1 %v3873_v11 }
 0x213   :  { %2082 = vmatprep.subr.bf16.mxu1 %v3878_v43 }
 0x215   :  { %1962 = vmatmul.mubr.bf16.gmra.mxu1 %v5126_v10 }
 0x216   :  { %2083 = vmatpush1.bf16.msra.mxu1 %v3876_v38  ;;  %2102 = vmatprep.mubr.bf16.mxu1 %v5610_v22 }
 0x217   :  { %2084 = vmatprep.subr.bf16.mxu1 %v3881_v12 }
 0x21a   :  { %2085 = vmatpush1.bf16.msra.mxu1 %v3879_v59 }
 0x21b   :  { %2444 = vmatprep.subr.bf16.mxu1 %v3884_v48 }
 0x21d   :  { %2103 = vmatmul.mubr.bf16.vlgmr.msra.gmra.mxu1 %v5023_v45  ;;  %v3893_v45 = vld [vmem:[%s5549_s3 + $0x244] ss:$8 sps:$4 sm:$0xff]  }
 0x21e   :  { %2445 = vmatpush1.bf16.msra.mxu1 %v3882_v31  ;;  %2112 = vmatprep.mubr.bf16.mxu1 %v5610_v22 }
 0x21f   :  { %2446 = vmatprep.subr.bf16.mxu1 %v3887_v14 }
 0x222   :  { %2447 = vmatpush1.bf16.msra.mxu1 %v3885_v39 }
 0x223   :  { %2448 = vmatprep.subr.bf16.mxu1 %v3890_v54 }
 0x225   :  { %2113 = vmatmul.mubr.bf16.gmra.mxu1 %v5080_v36 }
 0x226   :  { %2449 = vmatpush1.bf16.msra.mxu1 %v3888_v58  ;;  %2122 = vmatprep.mubr.bf16.mxu1 %v5610_v22 }
 0x227   :  { %2450 = vmatprep.subr.bf16.mxu1 %v3893_v45 }
 0x22a   :  { %2451 = vmatpush1.bf16.msra.mxu1 %v3891_v13 }
 0x22b   :  { %2452 = vmatprep.subr.bf16.mxu1 %v3896_v5 }
 0x22d   :  { %2123 = vmatmul.mubr.bf16.gmra.mxu1 %v5126_v10 }
 0x22e   :  { %2453 = vmatpush1.bf16.msra.mxu1 %v3894_v30  ;;  %2132 = vmatprep.mubr.bf16.mxu1 %v5610_v22 }
 0x22f   :  { %2454 = vmatprep.subr.bf16.mxu1 %v3899_v55 }
 0x232   :  { %2455 = vmatpush1.bf16.msra.mxu1 %v3897_v29 }
 0x233   :  { %2456 = vmatprep.subr.bf16.mxu1 %v3902_v20 }
 0x235   :  { %2133 = vmatmul.mubr.bf16.gmra.mxu1 %v5159_v28 }
 0x236   :  { %2457 = vmatpush1.bf16.msra.mxu1 %v3900_v53  ;;  %2476 = vmatprep.mubr.bf16.mxu1 %v5610_v22 }
 0x237   :  { %2458 = vmatprep.subr.bf16.mxu1 %v3905_v63 }
 0x23a   :  { %2459 = vmatpush1.bf16.msra.mxu1 %v3903_v4 }
 0x23b   :  { %3583 = vmatprep.subr.bf16.mxu1 %v3947_v24 }
 0x23d   :  { %2477 = vmatmul.mubr.bf16.vlgmr.msra.gmra.mxu1 %v5080_v36  ;;  %v3907_v36 = vld [vmem:[%s5551_s5 + $0x30] sm:$0xff]  }
 0x23e   :  { %2486 = vmatprep.mubr.bf16.mxu1 %v5610_v22  ;;  %3584 = vmatpush3.bf16.msra.mxu1 %v3906_v47 }
 0x23f   :  { %3585 = vmatprep.subr.bf16.mxu1 %v3947_v24 }
 0x242   :  { %3586 = vmatpush3.bf16.msra.mxu1 %v3907_v36 }
 0x243   :  { %3587 = vmatprep.subr.bf16.mxu1 %v3947_v24 }
 0x245   :  { %2487 = vmatmul.mubr.bf16.gmra.mxu1 %v5126_v10  ;;  %v3909_v10 = vld [vmem:[%s5551_s5 + $0x28] sm:$0xff]  }
 0x246   :  { %2496 = vmatprep.mubr.bf16.mxu1 %v5610_v22  ;;  %3588 = vmatpush3.bf16.msra.mxu1 %v3909_v10 }
 0x247   :  { %3589 = vmatprep.subr.bf16.mxu1 %v3947_v24 }
 0x24d   :  { %2497 = vmatmul.mubr.bf16.gmra.mxu1 %v5159_v28  ;;  %v3911_v28 = vld [vmem:[%s5551_s5 + $0x20] sm:$0xff]  }
 0x24e   :  { %2506 = vmatprep.mubr.bf16.mxu1 %v5610_v22  ;;  %v3908_v22 = vld [vmem:[%s5551_s5 + $0x78] sm:$0xff]   ;;  %3590 = vmatpush3.bf16.msra.mxu1 %v3911_v28 }
 0x24f   :  { %3564 = vmatpush3.bf16.msra.mxu0 %v3908_v22  ;;  %3591 = vmatprep.subr.bf16.mxu1 %v3947_v24 }
 0x250   :  { %3565 = vmatprep.subr.bf16.mxu0 %v3947_v24 }
 0x252   :  { %3592 = vmatpush3.bf16.msra.mxu1 %v3913_v7 }
 0x253   :  { %3566 = vmatpush3.bf16.msra.mxu0 %v3910_v18  ;;  %3593 = vmatprep.subr.bf16.mxu1 %v3947_v24 }
 0x254   :  { %3567 = vmatprep.subr.bf16.mxu0 %v3947_v24 }
 0x255   :  { %2507 = vmatmul.mubr.bf16.gmra.mxu1 %v2346_v33 }
 0x256   :  { %3594 = vmatpush3.bf16.msra.mxu1 %v3915_v0  ;;  %3599 = vmatprep.mubr.msk.bf16.mxu1 %vm3948_vm0, %v3947_v24 }
 0x257   :  { %3568 = vmatpush3.bf16.msra.mxu0 %v3912_v25  ;;  %3595 = vmatprep.subr.bf16.mxu1 %v3947_v24 }
 0x258   :  { %3569 = vmatprep.subr.bf16.mxu0 %v3947_v24 }
 0x25a   :  { %3596 = vmatpush3.bf16.msra.mxu1 %v3917_v42 }
 0x25b   :  { %3570 = vmatpush3.bf16.msra.mxu0 %v3914_v37  ;;  %3597 = vmatprep.subr.bf16.mxu1 %v3947_v24 }
 0x25c   :  { %3571 = vmatprep.subr.bf16.mxu0 %v3947_v24 }
 0x25e   :  { %3598 = vmatpush3.bf16.msra.mxu1 %v3919_v16 }
 0x25f   :  { %3572 = vmatpush3.bf16.msra.mxu0 %v3916_v6  ;;  %3623 = vmatprep.subr.bf16.mxu1 %v3947_v24 }
 0x260   :  { %3573 = vmatprep.subr.bf16.mxu0 %v3947_v24 }
 0x263   :  { %3574 = vmatpush3.bf16.msra.mxu0 %v3918_v34 }
 0x264   :  { %3575 = vmatprep.subr.bf16.mxu0 %v3947_v24 }
 0x267   :  { %3576 = vmatpush3.bf16.msra.mxu0 %v3920_v56 }
 0x268   :  { %3577 = vmatprep.subr.bf16.mxu0 %v3947_v24 }
 0x26b   :  { %3578 = vmatpush3.bf16.msra.mxu0 %v3922_v8 }
 0x26c   :  { %3603 = vmatprep.subr.bf16.mxu0 %v3947_v24 }
 0x285   :  { %v1780_v46 = vpop.f32.mrf.mxu1 }
 0x287   :  { %v5336_v52 = vpop.f32.mrf.mxu1 }
 0x289   :  { %v5343_v62 = vpop.f32.mrf.mxu1 }
 0x28b   :  { %v5349_v51 = vpop.f32.mrf.mxu1 }
 0x295   :  { %v1790_v9 = vpop.f32.mrf.mxu1  ;;  %v2291_v63 = vpop.f32.mrf.mxu0 }
 0x297   :  { %v5351_v15 = vpop.f32.mrf.mxu1  ;;  %v2293_v36 = vpop.f32.mrf.mxu0 }
 0x299   :  { %v5353_v35 = vpop.f32.mrf.mxu1  ;;  %v2295_v18 = vpop.f32.mrf.mxu0 }
 0x29b   :  { %v5355_v50 = vpop.f32.mrf.mxu1  ;;  %v2297_v7 = vpop.f32.mrf.mxu0 }
 0x2a5   :  { %v1800_v17 = vpop.f32.mrf.mxu1  ;;  %v2301_v0 = vpop.f32.mrf.mxu0 }
 0x2a7   :  { %v1802_v61 = vpop.f32.mrf.mxu1  ;;  %v2303_v34 = vpop.f32.mrf.mxu0 }
 0x2a9   :  { %v1804_v1 = vpop.f32.mrf.mxu1  ;;  %v2305_v56 = vpop.f32.mrf.mxu0 }
 0x2ab   :  { %v1806_v49 = vpop.f32.mrf.mxu1 }
 0x2b5   :  { %v1810_v44 = vpop.f32.mrf.mxu1 }
 0x2b7   :  { %v1812_v26 = vpop.f32.mrf.mxu1 }
 0x2b9   :  { %v1814_v27 = vpop.f32.mrf.mxu1 }
 0x2bb   :  { %v1816_v40 = vpop.f32.mrf.mxu1 }
 0x2bd   :  { %v1933_v57 = vpop.f32.mrf.mxu1 }
 0x2be   :  { %v1934_v19 = vadd.f32 %v1933_v57, %v1780_v46 }
 0x2bf   :  { %v1935_v2 = vpop.f32.mrf.mxu1 }
 0x2c0   :  { %v1936_v8 = vadd.f32 %v1935_v2, %v5336_v52  ;;  %v5638_v2 = vld [vmem:[#allocation35_spill] sm:$0xff] }
 0x2c1   :  { %v1937_v3 = vpop.f32.mrf.mxu1 }
 0x2c3   :  { %v1939_v60 = vpop.f32.mrf.mxu1 }
 0x2c5   :  { %v1943_v41 = vpop.f32.mrf.mxu1 }
 0x2c6   :  { %v1944_v21 = vadd.f32 %v1943_v41, %v1790_v9 }
 0x2c7   :  { %v1945_v23 = vpop.f32.mrf.mxu1 }
 0x2c9   :  { %v5357_v32 = vpop.f32.mrf.mxu1 }
 0x2cb   :  { %v5359_v33 = vpop.f32.mrf.mxu1 }
 0x2cd   :  { %v1953_v11 = vpop.f32.mrf.mxu1 }
 0x2ce   :  { %v5361_v43 = vadd.f32 %v1953_v11, %v1800_v17 }
 0x2cf   :  { %v1955_v38 = vpop.f32.mrf.mxu1 }
 0x2d0   :  { %v5363_v12 = vadd.f32 %v1955_v38, %v1802_v61  ;;  %v1938_v61 = vadd.f32 %v1937_v3, %v5343_v62  ;;  %v5639_v38 = vsub.s32 0, %v5638_v2  ;;  %v1946_v3 = vadd.f32 %v1945_v23, %v5351_v15 }
 0x2d1   :  { %v1957_v59 = vpop.f32.mrf.mxu1  ;;  %v1950_v15 = vadd.f32 %v5359_v33, %v5355_v50 }
 0x2d2   :  { %v5365_v48 = vadd.f32 %v1957_v59, %v1804_v1 }
 0x2d3   :  { %v1959_v31 = vpop.f32.mrf.mxu1 }
 0x2d4   :  { %v5367_v14 = vadd.f32 %v1959_v31, %v1806_v49 }
 0x2d5   :  { %v1963_v39 = vpop.f32.mrf.mxu1 }
 0x2d6   :  { %v5369_v54 = vadd.f32 %v1963_v39, %v1810_v44  ;;  %v2533_v44 = vld [vmem:[%s5552_s4] sm:$0x3] }
 0x2d7   :  { %v1965_v58 = vpop.f32.mrf.mxu1  ;;  %v5397_v59 = vrot.slane %v2533_v44, %v5639_v38 }
 0x2d8   :  { %v5371_v45 = vadd.f32 %v1965_v58, %v1812_v26  ;;  %v2307_v26 = vpop.f32.mrf.mxu0 }
 0x2d9   :  { %v1967_v13 = vpop.f32.mrf.mxu1 }
 0x2da   :  { %v5373_v5 = vadd.f32 %v1967_v13, %v1814_v27  ;;  %v1940_v27 = vadd.f32 %v1939_v60, %v5349_v51  ;;  %v2311_v11 = vpop.f32.mrf.mxu0  ;;  %v5640_v13 = vsub.s32 1, %v5638_v2  ;;  %v1948_v60 = vadd.f32 %v5357_v32, %v5353_v35 }
 0x2db   :  { %v1969_v30 = vpop.f32.mrf.mxu1 }
 0x2dc   :  { %v5375_v55 = vadd.f32 %v1969_v30, %v1816_v40  ;;  %v5402_v30 = vrot.slane %v2533_v44, %v5640_v13 }
 0x2dd   :  { %v2104_v29 = vpop.f32.mrf.mxu1 }
 0x2de   :  { %v2143_v9 = vadd.f32 %v2104_v29, %v1934_v19 }
 0x2df   :  { %v2106_v20 = vpop.f32.mrf.mxu1 }
 0x2e0   :  { %v2144_v1 = vadd.f32 %v2106_v20, %v1936_v8  ;;  %v2330_v57 = vadd.f32 %v2291_v63, %v2143_v9 }
 0x2e1   :  { %v2108_v53 = vpop.f32.mrf.mxu1 }
 0x2e2   :  { %v2145_v40 = vadd.f32 %v2108_v53, %v1938_v61  ;;  %v2331_v62 = vadd.f32 %v2293_v36, %v2144_v1  ;;  %v2313_v53 = vpop.f32.mrf.mxu0 }
 0x2e3   :  { %v2110_v4 = vpop.f32.mrf.mxu1 }
 0x2e4   :  { %v2146_v52 = vadd.f32 %v2110_v4, %v1940_v27  ;;  %v2332_v51 = vadd.f32 %v2295_v18, %v2145_v40 }
 0x2e5   :  { %v2114_v47 = vpop.f32.mrf.mxu1 }
 0x2e6   :  { %v2147_v39 = vadd.f32 %v2114_v47, %v1944_v21  ;;  %v2333_v36 = vadd.f32 %v2297_v7, %v2146_v52 }
 0x2e7   :  { %v2116_v22 = vpop.f32.mrf.mxu1 }
 0x2e8   :  { %v2148_v29 = vadd.f32 %v2116_v22, %v1946_v3  ;;  %v2334_v9 = vadd.f32 %v2301_v0, %v2147_v39  ;;  %v2315_v22 = vpop.f32.mrf.mxu0 }
 0x2e9   :  { %v2118_v10 = vpop.f32.mrf.mxu1 }
 0x2ea   :  { %v2149_v21 = vadd.f32 %v2118_v10, %v1948_v60  ;;  %v2335_v32 = vadd.f32 %v2303_v34, %v2148_v29  ;;  %v2317_v34 = vpop.f32.mrf.mxu0 }
 0x2eb   :  { %v2120_v28 = vpop.f32.mrf.mxu1 }
 0x2ec   :  { %v2150_v61 = vadd.f32 %v2120_v28, %v1950_v15  ;;  %v2336_v33 = vadd.f32 %v2305_v56, %v2149_v21 }
 0x2ed   :  { %v2124_v25 = vpop.f32.mrf.mxu1 }
 0x2ee   :  { %v2151_v40 = vadd.f32 %v2124_v25, %v5361_v43  ;;  %v2321_v25 = vpop.f32.mrf.mxu0 }
 0x2ef   :  { %v2126_v37 = vpop.f32.mrf.mxu1 }
 0x2f0   :  { %v2338_v43 = vadd.f32 %v2311_v11, %v2151_v40 }
 0x2f1   :  { %v5377_v6 = vpop.f32.mrf.mxu1 }
 0x2f2   :  { %v2153_v3 = vadd.f32 %v5377_v6, %v5365_v48 }
 0x2f3   :  { %v5379_v42 = vpop.f32.mrf.mxu1 }
 0x2f5   :  { %v5381_v16 = vpop.f32.mrf.mxu1 }
 0x2f7   :  { %v5383_v46 = vpop.f32.mrf.mxu1 }
 0x2f9   :  { %v5386_v17 = vpop.f32.mrf.mxu1 }
 0x2fb   :  { %v5389_v49 = vpop.f32.mrf.mxu1 }
 0x2fd   :  { %v2478_v41 = vpop.f32.mrf.mxu1 }
 0x2fe   :  { %v2517_v19 = vadd.f32 %v2478_v41, %v2330_v57 }
 0x2ff   :  { %v2480_v31 = vpop.f32.mrf.mxu1 }
 0x300   :  { %v2518_v58 = vadd.f32 %v2480_v31, %v2331_v62  ;;  %v2545_v63 = vadd.f32 %v5397_v59, %v2517_v19  ;;  %v2152_v19 = vadd.f32 %v2126_v37, %v5363_v12  ;;  %v2337_v62 = vadd.f32 %v2307_v26, %v2150_v61  ;;  %v3921_v26 = vld [vmem:[%s5551_s5 + $0xf8] sm:$0xff]  }
 0x301   :  { %v2482_v20 = vpop.f32.mrf.mxu1  ;;  %v2154_v12 = vadd.f32 %v5379_v42, %v5367_v14 }
 0x302   :  { %v2519_v4 = vadd.f32 %v2482_v20, %v2332_v51  ;;  %v2546_v47 = vadd.f32 %v5402_v30, %v2518_v58  ;;  %v2561_v1 = vmax.f32 %v2545_v63, 0.0  ;;  %v2339_v60 = vadd.f32 %v2313_v53, %v2152_v19 }
 0x303   :  { %v2484_v23 = vpop.f32.mrf.mxu1  ;;  %v2155_v20 = vadd.f32 %v5381_v16, %v5369_v54  ;;  %v2156_v53 = vadd.f32 %v5383_v46, %v5371_v45 }
 0x304   :  { %v2547_v8 = vadd.f32 %v5397_v59, %v2519_v4  ;;  %v2520_v18 = vadd.f32 %v2484_v23, %v2333_v36  ;;  %v2562_v10 = vmax.f32 %v2546_v47, 0.0  ;;  %v2340_v4 = vadd.f32 %v2315_v22, %v2153_v3  ;;  %v2323_v36 = vpop.f32.mrf.mxu0 }
 0x305   :  { %v2488_v35 = vpop.f32.mrf.mxu1  ;;  %v2342_v46 = vadd.f32 %v2321_v25, %v2155_v20  ;;  %v2343_v40 = vadd.f32 %v2323_v36, %v2156_v53  ;;  %v3934_v36 = vld [vmem:[%s5551_s5 + $0x90] sm:$0xff]  }
 0x306   :  { %v2563_v44 = vmax.f32 %v2547_v8, 0.0  ;;  %v2548_v27 = vadd.f32 %v5402_v30, %v2520_v18  ;;  %v2521_v7 = vadd.f32 %v2488_v35, %v2334_v9  ;;  %v3923_v8 = vld [vmem:[%s5551_s5 + $0xf0] sm:$0xff]   ;;  %v2341_v18 = vadd.f32 %v2317_v34, %v2154_v12  ;;  %v2325_v61 = vpop.f32.mrf.mxu0  ;;  %v3928_v12 = vld [vmem:[%s5551_s5 + $0xa8] sm:$0xff]  }
 0x307   :  { %v2490_v50 = vpop.f32.mrf.mxu1  ;;  %v2157_v9 = vadd.f32 %v5386_v17, %v5373_v5  ;;  %v3924_v5 = vld [vmem:[%s5551_s5 + $0xb8] sm:$0xff]   ;;  %v3925_v17 = vld [vmem:[%s5551_s5 + $0xe8] sm:$0xff]  }
 0x308   :  { %v2577_v57 = vmax.f32 %v2561_v1, %v2563_v44  ;;  %v2564_v41 = vmax.f32 %v2548_v27, 0.0  ;;  %v2522_v52 = vadd.f32 %v2490_v50, %v2335_v32  ;;  %v2549_v28 = vadd.f32 %v5397_v59, %v2521_v7 }
 0x309   :  { %v2492_v0 = vpop.f32.mrf.mxu1  ;;  %v2158_v44 = vadd.f32 %v5389_v49, %v5375_v55  ;;  %v2344_v49 = vadd.f32 %v2325_v61, %v2157_v9  ;;  %v3944_v9 = vld [vmem:[%s5553_s7 + $0x8] sm:$0xff]  }
 0x30a   :  { %v2578_v2 = vmax.f32 %v2562_v10, %v2564_v41  ;;  %v2523_v38 = vadd.f32 %v2492_v0, %v2336_v33  ;;  %v2550_v39 = vadd.f32 %v5402_v30, %v2522_v52  ;;  %v2565_v37 = vmax.f32 %v2549_v28, 0.0  ;;  %v2327_v41 = vpop.f32.mrf.mxu0 }
 0x30b   :  { %v2494_v31 = vpop.f32.mrf.mxu1 }
 0x30c   :  { %v2585_v56 = vmax.f32 %v2577_v57, %v2578_v2  ;;  %v2551_v58 = vadd.f32 %v5397_v59, %v2523_v38  ;;  %v2524_v13 = vadd.f32 %v2494_v31, %v2337_v62  ;;  %v2566_v15 = vmax.f32 %v2550_v39, 0.0  ;;  %v3926_v38 = vld [vmem:[%s5551_s5 + $0xb0] sm:$0xff]   ;;  %v3927_v62 = vld [vmem:[%s5551_s5 + $0xe0] sm:$0xff]  }
 0x30d   :  { %v2498_v51 = vpop.f32.mrf.mxu1  ;;  %v2345_v2 = vadd.f32 %v2327_v41, %v2158_v44 }
 0x30e   :  { %v2589_v48 = vpack.c.bf16 %v2585_v56, %v2585_v56  ;;  %v2567_v6 = vmax.f32 %v2551_v58, 0.0  ;;  %v2552_v11 = vadd.f32 %v5402_v30, %v2524_v13  ;;  %v2525_v29 = vadd.f32 %v2498_v51, %v2338_v43 }
 0x30f   :  { %v2500_v63 = vpop.f32.mrf.mxu1 }
 0x310   :  { %v2579_v14 = vmax.f32 %v2565_v37, %v2567_v6  ;;  %v2568_v42 = vmax.f32 %v2552_v11, 0.0  ;;  %v2526_v21 = vadd.f32 %v2500_v63, %v2339_v60  ;;  %3600 = vmatmul.mubr.bf16.vlgmr.msra.gmra.mxu1 %v2589_v48  ;;  %v2553_v23 = vadd.f32 %v5397_v59, %v2525_v29  ;;  %v3929_v37 = vld [vmem:[%s5551_s5 + $0xd8] sm:$0xff]   ;;  %v3930_v11 = vld [vmem:[%s5551_s5 + $0xa0] sm:$0xff]   ;;  %v3931_v29 = vld [vmem:[%s5551_s5 + $0xd0] sm:$0xff]  }
 0x311   :  { %3624 = vmatpush3.bf16.msra.mxu1 %v3921_v26  ;;  %v2502_v47 = vpop.f32.mrf.mxu1  ;;  %3639 = vmatprep.mubr.msk.bf16.mxu1 %vm3948_vm0, %v3947_v24  ;;  %v3932_v63 = vld [vmem:[%s5551_s5 + $0x98] sm:$0xff]  }
 0x312   :  { %v2580_v54 = vmax.f32 %v2566_v15, %v2568_v42  ;;  %v2527_v16 = vadd.f32 %v2502_v47, %v2340_v4  ;;  %3625 = vmatprep.subr.bf16.mxu1 %v3947_v24  ;;  %v2554_v32 = vadd.f32 %v5402_v30, %v2526_v21  ;;  %v2569_v27 = vmax.f32 %v2553_v23, 0.0  ;;  %v3933_v4 = vld [vmem:[%s5551_s5 + $0xc8] sm:$0xff]   ;;  %v3935_v15 = vld [vmem:[%s5551_s5 + $0xc0] sm:$0xff]   ;;  %v3938_v23 = vld [vmem:[%s5553_s7 + $0x38] sm:$0xff]  }
 0x313   :  { %v2504_v45 = vpop.f32.mrf.mxu1  ;;  %v3937_v21 = vld [vmem:[%s5551_s5 + $0x80] sm:$0xff]   ;;  %v3939_v47 = vld [vmem:[%s5553_s7 + $0x30] sm:$0xff]  }
 0x314   :  { %v2586_v35 = vmax.f32 %v2579_v14, %v2580_v54  ;;  %v2555_v22 = vadd.f32 %v5397_v59, %v2527_v16  ;;  %v2528_v1 = vadd.f32 %v2504_v45, %v2341_v18  ;;  %v2570_v52 = vmax.f32 %v2554_v32, 0.0  ;;  %v3936_v14 = vld [vmem:[%s5551_s5 + $0x88] sm:$0xff]   ;;  %v3941_v54 = vld [vmem:[%s5553_s7 + $0x20] sm:$0xff]   ;;  %v3942_v16 = vld [vmem:[%s5553_s7 + $0x18] sm:$0xff]  }
 0x315   :  { %3626 = vmatpush3.bf16.msra.mxu1 %v3923_v8  ;;  %v2508_v7 = vpop.f32.mrf.mxu1  ;;  %v3940_v8 = vld [vmem:[%s5553_s7 + $0x28] sm:$0xff]   ;;  %v3943_v18 = vld [vmem:[%s5553_s7 + $0x10] sm:$0xff]   ;;  %v3945_v45 = vld [vmem:[%s5553_s7] sm:$0xff]  }
 0x316   :  { %v2606_v50 = vpack.c.bf16 %v2586_v35, %v2586_v35  ;;  %v2571_v33 = vmax.f32 %v2555_v22, 0.0  ;;  %v2556_v10 = vadd.f32 %v5402_v30, %v2528_v1  ;;  %v2529_v57 = vadd.f32 %v2508_v7, %v2342_v46  ;;  %3627 = vmatprep.subr.bf16.mxu1 %v3947_v24 }
 0x317   :  { %v2510_v55 = vpop.f32.mrf.mxu1 }
 0x318   :  { %v2581_v19 = vmax.f32 %v2569_v27, %v2571_v33  ;;  %v2572_v28 = vmax.f32 %v2556_v10, 0.0  ;;  %v2530_v0 = vadd.f32 %v2510_v55, %v2343_v40  ;;  %3580 = vmatmul.mubr.bf16.vlgmr.msra.gmra.mxu0 %v2606_v50  ;;  %v2557_v31 = vadd.f32 %v5397_v59, %v2529_v57  ;;  %v3508_v10 = vld [vmem:[%s5554_s6] ss:$0 sm:$0xff] }
 0x319   :  { %3604 = vmatpush3.bf16.msra.mxu0 %v3924_v5  ;;  %3628 = vmatpush3.bf16.msra.mxu1 %v3925_v17  ;;  %v2512_v34 = vpop.f32.mrf.mxu1 }
 0x31a   :  { %v2582_v3 = vmax.f32 %v2570_v52, %v2572_v28  ;;  %v2531_v43 = vadd.f32 %v2512_v34, %v2344_v49  ;;  %3605 = vmatprep.subr.bf16.mxu0 %v3947_v24  ;;  %3629 = vmatprep.subr.bf16.mxu1 %v3947_v24  ;;  %v2558_v39 = vadd.f32 %v5402_v30, %v2530_v0  ;;  %v2573_v51 = vmax.f32 %v2557_v31, 0.0  ;;  %v3509_v0 = vld [vmem:[%s5555_s8] ss:$0 sm:$0xff] }
 0x31b   :  { %v2514_v25 = vpop.f32.mrf.mxu1  ;;  %3619 = vmatprep.mubr.msk.bf16.mxu0 %vm3948_vm0, %v3947_v24 }
 0x31c   :  { %v2587_v56 = vmax.f32 %v2581_v19, %v2582_v3  ;;  %v2559_v58 = vadd.f32 %v5397_v59, %v2531_v43  ;;  %v2532_v13 = vadd.f32 %v2514_v25, %v2345_v2  ;;  %v2574_v59 = vmax.f32 %v2558_v39, 0.0 }
 0x31d   :  { %3606 = vmatpush3.bf16.msra.mxu0 %v3926_v38  ;;  %3630 = vmatpush3.bf16.msra.mxu1 %v3927_v62 }
 0x31e   :  { %v2575_v60 = vmax.f32 %v2559_v58, 0.0  ;;  %v2560_v26 = vadd.f32 %v5402_v30, %v2532_v13  ;;  %3607 = vmatprep.subr.bf16.mxu0 %v3947_v24  ;;  %3631 = vmatprep.subr.bf16.mxu1 %v3947_v24  ;;  %v2800_v53 = vpack.c.bf16 %v2587_v56, %v2587_v56 }
 0x320   :  { %v2583_v48 = vmax.f32 %v2573_v51, %v2575_v60  ;;  %v2576_v6 = vmax.f32 %v2560_v26, 0.0 }
 0x321   :  { %3608 = vmatpush3.bf16.msra.mxu0 %v3928_v12  ;;  %3632 = vmatpush3.bf16.msra.mxu1 %v3929_v37 }
 0x322   :  { %v2584_v20 = vmax.f32 %v2574_v59, %v2576_v6  ;;  %3609 = vmatprep.subr.bf16.mxu0 %v3947_v24  ;;  %3633 = vmatprep.subr.bf16.mxu1 %v3947_v24 }
 0x324   :  { %v2588_v30 = vmax.f32 %v2583_v48, %v2584_v20 }
 0x325   :  { %3610 = vmatpush3.bf16.msra.mxu0 %v3930_v11  ;;  %3634 = vmatpush3.bf16.msra.mxu1 %v3931_v29 }
 0x326   :  { %3611 = vmatprep.subr.bf16.mxu0 %v3947_v24  ;;  %3635 = vmatprep.subr.bf16.mxu1 %v3947_v24  ;;  %v2907_v42 = vpack.c.bf16 %v2588_v30, %v2588_v30 }
 0x329   :  { %3612 = vmatpush3.bf16.msra.mxu0 %v3932_v63  ;;  %3636 = vmatpush3.bf16.msra.mxu1 %v3933_v4 }
 0x32a   :  { %3613 = vmatprep.subr.bf16.mxu0 %v3947_v24  ;;  %3637 = vmatprep.subr.bf16.mxu1 %v3947_v24 }
 0x32d   :  { %3614 = vmatpush3.bf16.msra.mxu0 %v3934_v36  ;;  %3638 = vmatpush3.bf16.msra.mxu1 %v3935_v15 }
 0x32e   :  { %3615 = vmatprep.subr.bf16.mxu0 %v3947_v24 }
 0x330   :  { %3640 = vmatmul.mubr.bf16.vlgmr.msra.gmra.mxu1 %v2907_v42 }
 0x331   :  { %3616 = vmatpush3.bf16.msra.mxu0 %v3936_v14 }
 0x332   :  { %3617 = vmatprep.subr.bf16.mxu0 %v3947_v24 }
 0x335   :  { %3618 = vmatpush3.bf16.msra.mxu0 %v3937_v21 }
 0x336   :  { %3643 = vmatprep.subr.bf16.mxu0 %v3947_v24 }
 0x338   :  { %3620 = vmatmul.mubr.bf16.vlgmr.msra.gmra.mxu0 %v2800_v53 }
 0x339   :  { %3659 = vmatprep.mubr.msk.bf16.mxu0 %vm3948_vm0, %v3947_v24  ;;  %3644 = vmatpush3.bf16.msra.mxu0 %v3938_v23 }
 0x33a   :  { %3645 = vmatprep.subr.bf16.mxu0 %v3947_v24 }
 0x33d   :  { %3646 = vmatpush3.bf16.msra.mxu0 %v3939_v47 }
 0x33e   :  { %3647 = vmatprep.subr.bf16.mxu0 %v3947_v24 }
 0x341   :  { %3648 = vmatpush3.bf16.msra.mxu0 %v3940_v8 }
 0x342   :  { %3649 = vmatprep.subr.bf16.mxu0 %v3947_v24 }
 0x345   :  { %3650 = vmatpush3.bf16.msra.mxu0 %v3941_v54 }
 0x346   :  { %3651 = vmatprep.subr.bf16.mxu0 %v3947_v24 }
 0x349   :  { %3652 = vmatpush3.bf16.msra.mxu0 %v3942_v16 }
 0x34a   :  { %3653 = vmatprep.subr.bf16.mxu0 %v3947_v24 }
 0x34d   :  { %3654 = vmatpush3.bf16.msra.mxu0 %v3943_v18 }
 0x34e   :  { %3655 = vmatprep.subr.bf16.mxu0 %v3947_v24 }
 0x351   :  { %3656 = vmatpush3.bf16.msra.mxu0 %v3944_v9 }
 0x352   :  { %3657 = vmatprep.subr.bf16.mxu0 %v3947_v24 }
 0x355   :  { %3658 = vmatpush3.bf16.msra.mxu0 %v3945_v45 }
 0x3d0   :  { %v2794_v46 = vpop.f32.mrf.mxu1 }
 0x3d2   :  { %v3601_v61 = vpop.f32.mrf.mxu1 }
 0x3d4   :  { %v2797_v35 = vpop.f32.mrf.mxu1 }
 0x3d6   :  { %v3602_v32 = vpop.f32.mrf.mxu1 }
 0x3d8   :  { %v2706_v22 = vpop.f32.mrf.mxu0 }
 0x3d9   :  { %v2795_v50 = vadd.f32 %v2794_v46, %v2706_v22 }
 0x3da   :  { %v3581_v1 = vpop.f32.mrf.mxu0 }
 0x3dc   :  { %v2709_v44 = vpop.f32.mrf.mxu0 }
 0x3de   :  { %v3582_v27 = vpop.f32.mrf.mxu0 }
 0x3f0   :  { %v3007_v7 = vpop.f32.mrf.mxu1 }
 0x3f2   :  { %v3641_v40 = vpop.f32.mrf.mxu1 }
 0x3f4   :  { %v3010_v5 = vpop.f32.mrf.mxu1 }
 0x3f6   :  { %v3642_v17 = vpop.f32.mrf.mxu1 }
 0x3f8   :  { %v2900_v33 = vpop.f32.mrf.mxu0 }
 0x3f9   :  { %v2906_v24 = vadd.f32 %v2900_v33, %v2795_v50 }
 0x3fa   :  { %v3621_v57 = vpop.f32.mrf.mxu0 }
 0x3fb   :  { %v3013_v55 = vadd.f32 %v3007_v7, %v2906_v24 }
 0x3fc   :  { %v2903_v49 = vpop.f32.mrf.mxu0 }
 0x3fd   :  { %v3021_v41 = vadd.f32 %v3508_v10, %v3013_v55 }
 0x3fe   :  { %v3622_v52 = vpop.f32.mrf.mxu0 }
 0x3ff   :  { %v3022_v19 = vmax.f32 %v3021_v41, 0.0 }
 0x401   :  { %v3023_v28 = vpack.c.bf16 %v3022_v19, %v3022_v19 }
 0x403   :  { %3660 = vmatmul.mubr.bf16.vlgmr.msra.gmra.mxu0 %v3023_v28 }
 0x4c3   :  { %v3129_v34 = vpop.f32.mrf.mxu0 }
 0x4c4   :  { %v3130_v2 = vadd.f32 %v3509_v0, %v3129_v34 }
 0x4c5   :  { %v3661_v38 = vpop.f32.mrf.mxu0 }
 0x4c6   :  { %3135 = vst [vmem:[%s5556_s9] sm:$0xff] %v3130_v2 }
 0x4c7   :  { %v3132_v62 = vpop.f32.mrf.mxu0 }
 0x4c9   :  { %v3662_v3 = vpop.f32.mrf.mxu0 }

</bundles_post_ra>
